<compile_context>
chip_gen: v7x
topology: tpu7x:2x2x1
jax: 0.10.0
libtpu: 0.0.40
codegen_flags: <defaults>
</compile_context>

<pallas_src>
import functools

import numpy as np
import jax
import jax.numpy as jnp
from jax import lax
from jax.experimental import pallas as pl
from jax.experimental.pallas import tpu as pltpu


def _vmem_limit_bytes():
    """Generation-aware scoped-VMEM limit: ~75% of physical VMEM, capped at 100 MiB."""
    cap = 128 * 1024 * 1024
    try:
        info = pltpu.get_tpu_info()
        cap = int(getattr(info, "vmem_capacity_bytes", cap))
    except Exception:
        pass
    return max(32 * 1024 * 1024, min((cap * 3) // 4, 100 * 1024 * 1024))


def _sublane_quantum(*dtypes):
    """Min sublane multiple for the given dtypes: 8 (4B), 16 (2B), 32 (1B)."""
    q = 8
    for d in dtypes:
        its = jnp.dtype(d).itemsize
        if its == 2:
            q = max(q, 16)
        elif its == 1:
            q = max(q, 32)
    return q


def _pick_tile(dim, target, quantum):
    """Largest multiple of `quantum` that divides `dim` and is <= target; else `dim` (full)."""
    t = min(dim, max(target, quantum))
    t -= t % quantum
    while t >= quantum:
        if dim % t == 0:
            return t
        t -= quantum
    return dim


# ----------------------------------------------------------------------------
# Kernel 1: QKV projection (weight column chunks resident across row tiles)
# ----------------------------------------------------------------------------
def _qkv_proj_kernel(x_ref, wq_ref, wk_ref, wv_ref, bq_ref, bk_ref, bv_ref,
                     q_ref, k_ref, v_ref):
    x = x_ref[0]                                               # (Tn, C), compute dtype
    q_ref[0] = (jnp.dot(x, wq_ref[...], preferred_element_type=jnp.float32)
                + bq_ref[0]).astype(q_ref.dtype)
    k_ref[0] = (jnp.dot(x, wk_ref[...], preferred_element_type=jnp.float32)
                + bk_ref[0]).astype(k_ref.dtype)
    v_ref[0] = (jnp.dot(x, wv_ref[...], preferred_element_type=jnp.float32)
                + bv_ref[0]).astype(v_ref.dtype)


def _qkv_proj(x, wq, wk, wv, bq, bk, bv, *, tn, tc, compute_dtype, vmem_limit):
    B, N, C = x.shape
    n_ctiles = C // tc
    n_rtiles = N // tn
    # Column-chunk axis OUTSIDE the row-tile axis: Wq/Wk/Wv chunks stay resident across
    # row tiles (weight HBM traffic = B*3*C^2 instead of B*(N/tn)*3*C^2).
    grid = (B, n_ctiles, n_rtiles)

    itm_x = jnp.dtype(x.dtype).itemsize
    itm_w = jnp.dtype(compute_dtype).itemsize
    itm_o = jnp.dtype(compute_dtype).itemsize
    cost = pl.CostEstimate(
        flops=int(6 * B * N * C * C),
        transcendentals=0,
        bytes_accessed=int(B * n_ctiles * N * C * itm_x      # x re-streamed per col chunk
                           + B * 3 * C * C * itm_w           # weights, once per batch
                           + 3 * B * N * C * itm_o))         # q/k/v writes

    return pl.pallas_call(
        _qkv_proj_kernel,
        out_shape=tuple(jax.ShapeDtypeStruct((B, N, C), compute_dtype) for _ in range(3)),
        grid_spec=pltpu.PrefetchScalarGridSpec(
            num_scalar_prefetch=0,
            grid=grid,
            in_specs=[
                pl.BlockSpec((1, tn, C), lambda b, j, i: (b, i, 0)),   # x row tile (streamed)
                pl.BlockSpec((C, tc), lambda b, j, i: (0, j)),         # Wq chunk (resident over i)
                pl.BlockSpec((C, tc), lambda b, j, i: (0, j)),         # Wk chunk
                pl.BlockSpec((C, tc), lambda b, j, i: (0, j)),         # Wv chunk
                pl.BlockSpec((1, tc), lambda b, j, i: (0, j)),         # bq chunk
                pl.BlockSpec((1, tc), lambda b, j, i: (0, j)),         # bk chunk
                pl.BlockSpec((1, tc), lambda b, j, i: (0, j)),         # bv chunk
            ],
            out_specs=[
                pl.BlockSpec((1, tn, tc), lambda b, j, i: (b, i, j)),
                pl.BlockSpec((1, tn, tc), lambda b, j, i: (b, i, j)),
                pl.BlockSpec((1, tn, tc), lambda b, j, i: (b, i, j)),
            ],
        ),
        compiler_params=pltpu.CompilerParams(
            dimension_semantics=("parallel", "parallel", "parallel"),
            vmem_limit_bytes=vmem_limit,
        ),
        cost_estimate=cost,
    )(x, wq, wk, wv, bq, bk, bv)


# ----------------------------------------------------------------------------
# Kernel 2: flash attention (online softmax over KV tiles) + residual + LayerNorm1
# ----------------------------------------------------------------------------
def _flash_attn_res_ln_kernel(x_ref, q_ref, k_ref, v_ref, gamma_ref, beta_ref,
                              o_ref, m_scr, l_scr, acc_scr,
                              *, num_heads, head_dim, ln_eps, approx_recip):
    ki = pl.program_id(2)
    nkv = pl.num_programs(2)

    @pl.when(ki == 0)
    def _init():
        m_scr[...] = jnp.full(m_scr.shape, -jnp.inf, dtype=m_scr.dtype)
        l_scr[...] = jnp.zeros(l_scr.shape, dtype=l_scr.dtype)
        acc_scr[...] = jnp.zeros(acc_scr.shape, dtype=acc_scr.dtype)

    # Per-head 2-D matmuls on static, lane-contiguous column slices.
    # Softmax scale is pre-folded into Wq/bq in the wrapper (no per-step VPU multiply).
    # TODO(synk): if a bundle dump shows vreg spills for very large num_heads, switch this
    #             static Python loop to lax.fori_loop-bounded chunks.
    for h in range(num_heads):
        lo = h * head_dim
        hi = lo + head_dim
        q_h = q_ref[0, :, lo:hi]                                   # (Tq, hd), compute dtype
        k_h = k_ref[0, :, lo:hi]                                   # (Tk, hd)
        v_h = v_ref[0, :, lo:hi]                                   # (Tk, hd)

        # scores = q_h @ k_h^T (contraction over head_dim), f32 accumulation
        s = lax.dot_general(q_h, k_h, (((1,), (1,)), ((), ())),
                            preferred_element_type=jnp.float32)    # (Tq, Tk)

        m_prev = m_scr[h]                                          # (Tq, 1)
        m_new = jnp.maximum(m_prev, jnp.max(s, axis=-1, keepdims=True))
        alpha = jnp.exp(m_prev - m_new)
        p = jnp.exp(s - m_new)                                     # (Tq, Tk), f32
        l_scr[h] = alpha * l_scr[h] + jnp.sum(p, axis=-1, keepdims=True)
        acc_scr[:, lo:hi] = alpha * acc_scr[:, lo:hi] + jnp.dot(
            p.astype(v_h.dtype), v_h, preferred_element_type=jnp.float32)
        m_scr[h] = m_new

    @pl.when(ki == nkv - 1)
    def _finalize():
        # Normalize each head in place (single (Tq, C) accumulator, no extra copy pass).
        for h in range(num_heads):
            lo = h * head_dim
            hi = lo + head_dim
            inv_l = pl.reciprocal(l_scr[h], approx=approx_recip)
            acc_scr[:, lo:hi] = acc_scr[:, lo:hi] * inv_l

        # residual add (dropout1 = identity, eval) + LayerNorm1, all f32
        y = x_ref[0].astype(jnp.float32) + acc_scr[...]
        mu = jnp.mean(y, axis=-1, keepdims=True)
        var = jnp.mean(jnp.square(y - mu), axis=-1, keepdims=True)
        y = (y - mu) * lax.rsqrt(var + ln_eps)
        y = y * gamma_ref[0] + beta_ref[0]
        o_ref[0] = y.astype(o_ref.dtype)


def _flash_attention_residual_ln(x, q, k, v, gamma, beta, *, num_heads, tq, tk,
                                 ln_eps, approx_recip, vmem_limit):
    B, N, C = x.shape
    hd = C // num_heads
    grid = (B, N // tq, N // tk)
    kernel = functools.partial(_flash_attn_res_ln_kernel, num_heads=num_heads,
                               head_dim=hd, ln_eps=ln_eps, approx_recip=approx_recip)

    itm_x = jnp.dtype(x.dtype).itemsize
    itm_q = jnp.dtype(q.dtype).itemsize
    n_qtiles = N // tq
    cost = pl.CostEstimate(
        flops=int(4 * B * N * N * C),
        transcendentals=int(B * num_heads * N * N),
        bytes_accessed=int(2 * B * N * C * itm_x                  # x read + y1 write
                           + B * N * C * itm_q                    # q
                           + 2 * B * n_qtiles * N * C * itm_q))   # k/v re-streamed per Q tile

    return pl.pallas_call(
        kernel,
        out_shape=jax.ShapeDtypeStruct((B, N, C), x.dtype),
        grid_spec=pltpu.PrefetchScalarGridSpec(
            num_scalar_prefetch=0,
            grid=grid,
            in_specs=[
                pl.BlockSpec((1, tq, C), lambda b, qi, ki: (b, qi, 0)),  # x (residual)
                pl.BlockSpec((1, tq, C), lambda b, qi, ki: (b, qi, 0)),  # q
                pl.BlockSpec((1, tk, C), lambda b, qi, ki: (b, ki, 0)),  # k
                pl.BlockSpec((1, tk, C), lambda b, qi, ki: (b, ki, 0)),  # v
                pl.BlockSpec((1, C), lambda b, qi, ki: (0, 0)),          # gamma1
                pl.BlockSpec((1, C), lambda b, qi, ki: (0, 0)),          # beta1
            ],
            out_specs=pl.BlockSpec((1, tq, C), lambda b, qi, ki: (b, qi, 0)),
            scratch_shapes=[
                pltpu.VMEM((num_heads, tq, 1), jnp.float32),   # running max
                pltpu.VMEM((num_heads, tq, 1), jnp.float32),   # running sum
                pltpu.VMEM((tq, C), jnp.float32),              # lane-dense accumulator
            ],
        ),
        compiler_params=pltpu.CompilerParams(
            dimension_semantics=("parallel", "parallel", "arbitrary"),
            vmem_limit_bytes=vmem_limit,
        ),
        cost_estimate=cost,
    )(x, q, k, v, gamma, beta)


# ----------------------------------------------------------------------------
# Kernel 3: Linear + residual + LayerNorm2
# ----------------------------------------------------------------------------
def _linear_res_ln_kernel(y_ref, w_ref, bias_ref, gamma_ref, beta_ref, o_ref,
                          *, ln_eps, compute_dtype):
    y = y_ref[0]                                                       # (Tn, C)
    z = jnp.dot(y.astype(compute_dtype), w_ref[...],
                preferred_element_type=jnp.float32) + bias_ref[0]
    z = y.astype(jnp.float32) + z                                      # residual (dropout2 identity)
    mu = jnp.mean(z, axis=-1, keepdims=True)
    var = jnp.mean(jnp.square(z - mu), axis=-1, keepdims=True)
    z = (z - mu) * lax.rsqrt(var + ln_eps)
    o_ref[0] = (z * gamma_ref[0] + beta_ref[0]).astype(o_ref.dtype)


def _linear_residual_ln(y, w, bias, gamma, beta, *, tn, ln_eps, compute_dtype, vmem_limit):
    B, N, C = y.shape
    grid = (B, N // tn)
    kernel = functools.partial(_linear_res_ln_kernel, ln_eps=ln_eps,
                               compute_dtype=compute_dtype)

    itm = jnp.dtype(y.dtype).itemsize
    itm_w = jnp.dtype(compute_dtype).itemsize
    cost = pl.CostEstimate(
        flops=int(2 * B * N * C * C),
        transcendentals=int(B * N),
        bytes_accessed=int(2 * B * N * C * itm + C * C * itm_w))

    return pl.pallas_call(
        kernel,
        out_shape=jax.ShapeDtypeStruct((B, N, C), y.dtype),
        grid_spec=pltpu.PrefetchScalarGridSpec(
            num_scalar_prefetch=0,
            grid=grid,
            in_specs=[
                pl.BlockSpec((1, tn, C), lambda b, i: (b, i, 0)),
                pl.BlockSpec((C, C), lambda b, i: (0, 0)),
                pl.BlockSpec((1, C), lambda b, i: (0, 0)),
                pl.BlockSpec((1, C), lambda b, i: (0, 0)),
                pl.BlockSpec((1, C), lambda b, i: (0, 0)),
            ],
            out_specs=pl.BlockSpec((1, tn, C), lambda b, i: (b, i, 0)),
        ),
        compiler_params=pltpu.CompilerParams(
            dimension_semantics=("parallel", "parallel"),
            vmem_limit_bytes=vmem_limit,
        ),
        cost_estimate=cost,
    )(y, w, bias, gamma, beta)


# ----------------------------------------------------------------------------
# Full block wrapper
# ----------------------------------------------------------------------------
def trans_encoder_block_pallas(x, params, num_heads, *,
                               q_tile=256, kv_tile=256, row_tile=256, col_tile=512,
                               compute_dtype=None, ln_eps=1e-5):
    """x: (B, N, C). params = (w_qkv (C,3C), b_qkv (3C,), w_lin (C,C), b_lin (C,),
    gamma1 (C,), beta1 (C,), gamma2 (C,), beta2 (C,)).  y = x @ W + b layout."""
    w_qkv, b_qkv, w_lin, b_lin, gamma1, beta1, gamma2, beta2 = params
    B, N, C = x.shape
    assert C % num_heads == 0
    hd = C // num_heads
    if compute_dtype is None:
        compute_dtype = x.dtype
    compute_dtype = jnp.dtype(compute_dtype)
    vmem_limit = _vmem_limit_bytes()

    # Fold the softmax scale into Wq / bq once at trace time (removes a (Tq,hd) VPU mul
    # per head per KV step inside K2).
    scale = jnp.float32(hd) ** -0.5
    wq = (w_qkv[:, 0:C] * scale).astype(compute_dtype)
    wk = w_qkv[:, C:2 * C].astype(compute_dtype)
    wv = w_qkv[:, 2 * C:3 * C].astype(compute_dtype)
    bq = (b_qkv[0:C] * scale).reshape(1, C).astype(jnp.float32)
    bk = b_qkv[C:2 * C].reshape(1, C).astype(jnp.float32)
    bv = b_qkv[2 * C:3 * C].reshape(1, C).astype(jnp.float32)

    # dtype/MXU-aware tile quanta: sublane quantum 8 (f32) / 16 (bf16) for row/Q tiles,
    # 128-lane quantum for the KV / weight-column tiles (tk is the score-tile lane dim and
    # the P@V contraction dim, so it is the one that feeds the MXU).
    sub_q = _sublane_quantum(x.dtype, compute_dtype)
    tn = _pick_tile(N, row_tile, sub_q)
    tq = _pick_tile(N, q_tile, sub_q)
    tk = _pick_tile(N, kv_tile, 128)
    tc = _pick_tile(C, col_tile, 128)

    # K1 input/outputs live in compute_dtype (halves HBM traffic for bf16 on v6e/v7x);
    # K2 keeps the original-precision x for the residual + LayerNorm math.
    x_k1 = x.astype(compute_dtype)
    q, k, v = _qkv_proj(x_k1, wq, wk, wv, bq, bk, bv, tn=tn, tc=tc,
                        compute_dtype=compute_dtype, vmem_limit=vmem_limit)

    approx_recip = compute_dtype != jnp.dtype(jnp.float32)
    y1 = _flash_attention_residual_ln(
        x, q, k, v, gamma1.reshape(1, C).astype(jnp.float32),
        beta1.reshape(1, C).astype(jnp.float32),
        num_heads=num_heads, tq=tq, tk=tk, ln_eps=ln_eps,
        approx_recip=approx_recip, vmem_limit=vmem_limit)

    y2 = _linear_residual_ln(
        y1, w_lin.astype(compute_dtype), b_lin.reshape(1, C).astype(jnp.float32),
        gamma2.reshape(1, C).astype(jnp.float32), beta2.reshape(1, C).astype(jnp.float32),
        tn=tn, ln_eps=ln_eps, compute_dtype=compute_dtype, vmem_limit=vmem_limit)
    return y2


# ----------------------------------------------------------------------------
# Pure-JAX reference (matches the PyTorch forward in eval mode)
# ----------------------------------------------------------------------------
def _layernorm_ref(x, g, b, eps):
    mu = jnp.mean(x, axis=-1, keepdims=True)
    var = jnp.mean(jnp.square(x - mu), axis=-1, keepdims=True)
    return (x - mu) * lax.rsqrt(var + eps) * g + b


def trans_encoder_block_reference(x, params, num_heads, ln_eps=1e-5):
    w_qkv, b_qkv, w_lin, b_lin, gamma1, beta1, gamma2, beta2 = params
    B, N, C = x.shape
    hd = C // num_heads
    scale = hd ** (-0.5)
    qkv = jnp.einsum('bnc,cd->bnd', x, w_qkv) + b_qkv
    qkv = qkv.reshape(B, N, 3, num_heads, hd).transpose(2, 0, 3, 1, 4)
    q, k, v = qkv[0], qkv[1], qkv[2]                                  # (B, H, N, hd)
    attn = jnp.einsum('bhqd,bhkd->bhqk', q, k) * scale
    attn = jax.nn.softmax(attn, axis=-1)
    a = jnp.einsum('bhqk,bhkd->bhqd', attn, v).transpose(0, 2, 1, 3).reshape(B, N, C)
    y1 = _layernorm_ref(x + a, gamma1, beta1, ln_eps)
    y2 = _layernorm_ref(y1 + jnp.einsum('bnc,cd->bnd', y1, w_lin) + b_lin,
                        gamma2, beta2, ln_eps)
    return y2


if __name__ == "__main__":
    # Shapes chosen so the new grid orders / tilings are actually exercised:
    # 2 column tiles in K1, 2 Q tiles x 2 KV tiles in K2, 2 row tiles in K1/K3.
    B, N, C, H = 2, 256, 256, 4

    key = jax.random.PRNGKey(0)
    keys = jax.random.split(key, 9)
    x = jax.random.normal(keys[0], (B, N, C), dtype=jnp.float32)
    w_qkv = jax.random.normal(keys[1], (C, 3 * C), dtype=jnp.float32) * (C ** -0.5)
    b_qkv = jax.random.normal(keys[2], (3 * C,), dtype=jnp.float32) * 0.02
    w_lin = jax.random.normal(keys[3], (C, C), dtype=jnp.float32) * (C ** -0.5)
    b_lin = jax.random.normal(keys[4], (C,), dtype=jnp.float32) * 0.02
    gamma1 = 1.0 + 0.1 * jax.random.normal(keys[5], (C,), dtype=jnp.float32)
    beta1 = 0.1 * jax.random.normal(keys[6], (C,), dtype=jnp.float32)
    gamma2 = 1.0 + 0.1 * jax.random.normal(keys[7], (C,), dtype=jnp.float32)
    beta2 = 0.1 * jax.random.normal(keys[8], (C,), dtype=jnp.float32)
    params = (w_qkv, b_qkv, w_lin, b_lin, gamma1, beta1, gamma2, beta2)

    # f32 compute keeps the correctness check tight; on v6e/v7x pass
    # compute_dtype=jnp.bfloat16 and the default 256/512 tile targets for throughput.
    out = trans_encoder_block_pallas(
        x, params, num_heads=H,
        q_tile=128, kv_tile=128, row_tile=128, col_tile=128,
        compute_dtype=jnp.float32)
    out = jax.block_until_ready(out)

    ref = trans_encoder_block_reference(x, params, num_heads=H)
    assert out.shape == (B, N, C)
    max_err = float(jnp.max(jnp.abs(out - ref)))
    assert jnp.allclose(out, ref, atol=5e-3, rtol=5e-3), (
        f"mismatch vs reference, max abs err={max_err}")

    print("KERNEL_OK")
</pallas_src>

<mosaic_0001>
module attributes {stable_mosaic.version = 11 : i64} {
  func.func @_qkv_proj_kernel(%arg0: i32, %arg1: i32, %arg2: i32, %arg3: memref<1x128x256xf32, #tpu.memory_space<vmem>>, %arg4: memref<256x128xf32, #tpu.memory_space<vmem>>, %arg5: memref<256x128xf32, #tpu.memory_space<vmem>>, %arg6: memref<256x128xf32, #tpu.memory_space<vmem>>, %arg7: memref<1x128xf32, #tpu.memory_space<vmem>>, %arg8: memref<1x128xf32, #tpu.memory_space<vmem>>, %arg9: memref<1x128xf32, #tpu.memory_space<vmem>>, %arg10: memref<1x128x128xf32, #tpu.memory_space<vmem>>, %arg11: memref<1x128x128xf32, #tpu.memory_space<vmem>>, %arg12: memref<1x128x128xf32, #tpu.memory_space<vmem>>) attributes {dimension_semantics = [#tpu.dimension_semantics<parallel>, #tpu.dimension_semantics<parallel>, #tpu.dimension_semantics<parallel>], iteration_bounds = array<i64: 2, 2, 2>, scalar_prefetch = 0 : i64, scratch_operands = 0 : i64, tpu.core_type = #tpu.core_type<tc>, window_params = [{transform_indices = @transform_0, window_bounds = array<i64: 1, 128, 256>}, {transform_indices = @transform_1, window_bounds = array<i64: 256, 128>}, {transform_indices = @transform_2, window_bounds = array<i64: 256, 128>}, {transform_indices = @transform_3, window_bounds = array<i64: 256, 128>}, {transform_indices = @transform_4, window_bounds = array<i64: 1, 128>}, {transform_indices = @transform_5, window_bounds = array<i64: 1, 128>}, {transform_indices = @transform_6, window_bounds = array<i64: 1, 128>}, {transform_indices = @transform_7, window_bounds = array<i64: 1, 128, 128>}, {transform_indices = @transform_8, window_bounds = array<i64: 1, 128, 128>}, {transform_indices = @transform_9, window_bounds = array<i64: 1, 128, 128>}]} {
    %c0 = arith.constant 0 : index
    %c0_0 = arith.constant 0 : index
    %c0_1 = arith.constant 0 : index
    %0 = vector.load %arg3[%c0, %c0_0, %c0_1] : memref<1x128x256xf32, #tpu.memory_space<vmem>>, vector<1x128x256xf32>
    %1 = vector.shape_cast %0 : vector<1x128x256xf32> to vector<128x256xf32>
    %c0_2 = arith.constant 0 : index
    %c0_3 = arith.constant 0 : index
    %2 = vector.load %arg4[%c0_2, %c0_3] : memref<256x128xf32, #tpu.memory_space<vmem>>, vector<256x128xf32>
    %cst = arith.constant dense<0.000000e+00> : vector<128x128xf32>
    %3 = tpu.matmul %1, %2, %cst {dimension_numbers = #tpu.dot_dimension_numbers<[1], [0], [0], [1], [0, 0, 1, 1], [], []>} : vector<128x256xf32>, vector<256x128xf32>, vector<128x128xf32> -> vector<128x128xf32>
    %c0_4 = arith.constant 0 : index
    %c0_5 = arith.constant 0 : index
    %4 = vector.load %arg7[%c0_4, %c0_5] : memref<1x128xf32, #tpu.memory_space<vmem>>, vector<1x128xf32>
    %5 = vector.shape_cast %4 : vector<1x128xf32> to vector<128xf32>
    %6 = vector.shape_cast %5 : vector<128xf32> to vector<1x128xf32>
    %7 = vector.broadcast %6 : vector<1x128xf32> to vector<128x128xf32>
    %8 = arith.addf %3, %7 : vector<128x128xf32>
    %c0_6 = arith.constant 0 : index
    %c0_7 = arith.constant 0 : index
    %c0_8 = arith.constant 0 : index
    %9 = vector.load %arg10[%c0_6, %c0_7, %c0_8] : memref<1x128x128xf32, #tpu.memory_space<vmem>>, vector<1x128x128xf32>
    %10 = vector.shape_cast %9 : vector<1x128x128xf32> to vector<128x128xf32>
    %11 = vector.shape_cast %8 : vector<128x128xf32> to vector<1x128x128xf32>
    tpu.vector_store %arg10[%c0_6, %c0_7, %c0_8], %11 {strides = array<i32>} : memref<1x128x128xf32, #tpu.memory_space<vmem>>, vector<1x128x128xf32>,
    %c0_9 = arith.constant 0 : index
    %c0_10 = arith.constant 0 : index
    %12 = vector.load %arg5[%c0_9, %c0_10] : memref<256x128xf32, #tpu.memory_space<vmem>>, vector<256x128xf32>
    %cst_11 = arith.constant dense<0.000000e+00> : vector<128x128xf32>
    %13 = tpu.matmul %1, %12, %cst_11 {dimension_numbers = #tpu.dot_dimension_numbers<[1], [0], [0], [1], [0, 0, 1, 1], [], []>} : vector<128x256xf32>, vector<256x128xf32>, vector<128x128xf32> -> vector<128x128xf32>
    %c0_12 = arith.constant 0 : index
    %c0_13 = arith.constant 0 : index
    %14 = vector.load %arg8[%c0_12, %c0_13] : memref<1x128xf32, #tpu.memory_space<vmem>>, vector<1x128xf32>
    %15 = vector.shape_cast %14 : vector<1x128xf32> to vector<128xf32>
    %16 = vector.shape_cast %15 : vector<128xf32> to vector<1x128xf32>
    %17 = vector.broadcast %16 : vector<1x128xf32> to vector<128x128xf32>
    %18 = arith.addf %13, %17 : vector<128x128xf32>
    %c0_14 = arith.constant 0 : index
    %c0_15 = arith.constant 0 : index
    %c0_16 = arith.constant 0 : index
    %19 = vector.load %arg11[%c0_14, %c0_15, %c0_16] : memref<1x128x128xf32, #tpu.memory_space<vmem>>, vector<1x128x128xf32>
    %20 = vector.shape_cast %19 : vector<1x128x128xf32> to vector<128x128xf32>
    %21 = vector.shape_cast %18 : vector<128x128xf32> to vector<1x128x128xf32>
    tpu.vector_store %arg11[%c0_14, %c0_15, %c0_16], %21 {strides = array<i32>} : memref<1x128x128xf32, #tpu.memory_space<vmem>>, vector<1x128x128xf32>,
    %c0_17 = arith.constant 0 : index
    %c0_18 = arith.constant 0 : index
    %22 = vector.load %arg6[%c0_17, %c0_18] : memref<256x128xf32, #tpu.memory_space<vmem>>, vector<256x128xf32>
    %cst_19 = arith.constant dense<0.000000e+00> : vector<128x128xf32>
    %23 = tpu.matmul %1, %22, %cst_19 {dimension_numbers = #tpu.dot_dimension_numbers<[1], [0], [0], [1], [0, 0, 1, 1], [], []>} : vector<128x256xf32>, vector<256x128xf32>, vector<128x128xf32> -> vector<128x128xf32>
    %c0_20 = arith.constant 0 : index
    %c0_21 = arith.constant 0 : index
    %24 = vector.load %arg9[%c0_20, %c0_21] : memref<1x128xf32, #tpu.memory_space<vmem>>, vector<1x128xf32>
    %25 = vector.shape_cast %24 : vector<1x128xf32> to vector<128xf32>
    %26 = vector.shape_cast %25 : vector<128xf32> to vector<1x128xf32>
    %27 = vector.broadcast %26 : vector<1x128xf32> to vector<128x128xf32>
    %28 = arith.addf %23, %27 : vector<128x128xf32>
    %c0_22 = arith.constant 0 : index
    %c0_23 = arith.constant 0 : index
    %c0_24 = arith.constant 0 : index
    %29 = vector.load %arg12[%c0_22, %c0_23, %c0_24] : memref<1x128x128xf32, #tpu.memory_space<vmem>>, vector<1x128x128xf32>
    %30 = vector.shape_cast %29 : vector<1x128x128xf32> to vector<128x128xf32>
    %31 = vector.shape_cast %28 : vector<128x128xf32> to vector<1x128x128xf32>
    tpu.vector_store %arg12[%c0_22, %c0_23, %c0_24], %31 {strides = array<i32>} : memref<1x128x128xf32, #tpu.memory_space<vmem>>, vector<1x128x128xf32>,
    return
  }
  func.func @transform_0(%arg0: i32, %arg1: i32, %arg2: i32) -> (i32, i32, i32) {
    %c0_i32 = arith.constant 0 : i32
    %c0_i32_0 = arith.constant 0 : i32
    return %arg0, %arg2, %c0_i32 : i32, i32, i32
  }
  func.func @transform_1(%arg0: i32, %arg1: i32, %arg2: i32) -> (i32, i32) {
    %c0_i32 = arith.constant 0 : i32
    %c0_i32_0 = arith.constant 0 : i32
    return %c0_i32, %arg1 : i32, i32
  }
  func.func @transform_2(%arg0: i32, %arg1: i32, %arg2: i32) -> (i32, i32) {
    %c0_i32 = arith.constant 0 : i32
    %c0_i32_0 = arith.constant 0 : i32
    return %c0_i32, %arg1 : i32, i32
  }
  func.func @transform_3(%arg0: i32, %arg1: i32, %arg2: i32) -> (i32, i32) {
    %c0_i32 = arith.constant 0 : i32
    %c0_i32_0 = arith.constant 0 : i32
    return %c0_i32, %arg1 : i32, i32
  }
  func.func @transform_4(%arg0: i32, %arg1: i32, %arg2: i32) -> (i32, i32) {
    %c0_i32 = arith.constant 0 : i32
    %c0_i32_0 = arith.constant 0 : i32
    return %c0_i32, %arg1 : i32, i32
  }
  func.func @transform_5(%arg0: i32, %arg1: i32, %arg2: i32) -> (i32, i32) {
    %c0_i32 = arith.constant 0 : i32
    %c0_i32_0 = arith.constant 0 : i32
    return %c0_i32, %arg1 : i32, i32
  }
  func.func @transform_6(%arg0: i32, %arg1: i32, %arg2: i32) -> (i32, i32) {
    %c0_i32 = arith.constant 0 : i32
    %c0_i32_0 = arith.constant 0 : i32
    return %c0_i32, %arg1 : i32, i32
  }
  func.func @transform_7(%arg0: i32, %arg1: i32, %arg2: i32) -> (i32, i32, i32) {
    %c0_i32 = arith.constant 0 : i32
    return %arg0, %arg2, %arg1 : i32, i32, i32
  }
  func.func @transform_8(%arg0: i32, %arg1: i32, %arg2: i32) -> (i32, i32, i32) {
    %c0_i32 = arith.constant 0 : i32
    return %arg0, %arg2, %arg1 : i32, i32, i32
  }
  func.func @transform_9(%arg0: i32, %arg1: i32, %arg2: i32) -> (i32, i32, i32) {
    %c0_i32 = arith.constant 0 : i32
    return %arg0, %arg2, %arg1 : i32, i32, i32
  }
}

</mosaic_0001>

<bundles_post_ra>
// kernel: tpu_custom_call.1
= control target key start
LH: loop header
LB: loop body
LE: loop exit
PB: predicated region body
PF: predicated region fallthrough
CT: control target
= control target key end

     0   :  { %s3740_s0 = inlined_call_operand.hbm [shape: f32[2,256,256], index: 0, kind: input, shape index: {}]   ;;  %s3741_s1 = inlined_call_operand.hbm [shape: f32[256,256], index: 1, kind: input, shape index: {}]   ;;  %s3742_s2 = inlined_call_operand.hbm [shape: f32[256,256], index: 2, kind: input, shape index: {}]   ;;  %s3743_s3 = inlined_call_operand.hbm [shape: f32[256,256], index: 3, kind: input, shape index: {}]   ;;  %s3744_s4 = inlined_call_operand.hbm [shape: f32[1,256], index: 4, kind: input, shape index: {}]   ;;  %s3745_s5 = inlined_call_operand.hbm [shape: f32[1,256], index: 5, kind: input, shape index: {}]   ;;  %s3746_s6 = inlined_call_operand.hbm [shape: f32[1,256], index: 6, kind: input, shape index: {}]   ;;  %s3747_s7 = inlined_call_operand.hbm [shape: f32[2,256,256], index: 7, kind: output, shape index: {0}]   ;;  %s3748_s8 = inlined_call_operand.hbm [shape: f32[2,256,256], index: 8, kind: output, shape index: {1}]   ;;  %s3749_s9 = inlined_call_operand.hbm [shape: f32[2,256,256], index: 9, kind: output, shape index: {2}]  }
   0x1   :  { %3792 = sst [smem:[#allocation44_spill]] %s3740_s0 }
   0x2   :  { %3793 = sst [smem:[#allocation45_spill]] %s3741_s1 }
   0x3   :  { %3794 = sst [smem:[#allocation46_spill]] %s3742_s2 }
   0x4   :  { %3795 = sst [smem:[#allocation47_spill]] %s3743_s3 }
   0x5   :  { %3796 = sst [smem:[#allocation48_spill]] %s3744_s4 }
   0x6   :  { %3797 = sst [smem:[#allocation49_spill]] %s3745_s5 }
   0x7   :  { %3798 = sst [smem:[#allocation50_spill]] %s3746_s6 }
   0x8   :  { %3799 = sst [smem:[#allocation51_spill]] %s3747_s7 }
   0x9   :  { %3800 = sst [smem:[#allocation52_spill]] %s3748_s8 }
   0xa   :  { %3801 = sst [smem:[#allocation53_spill]] %s3749_s9 }
   0xb   :  { %15 = vsyncpa [#allocation3], 0 }
   0xc   :  { %17 = vsyncpa [#allocation3 + $0x1], 0 }
   0xd   :  { %18 = vsyncpa [#allocation6], 0 }
   0xe   :  { %20 = vsyncpa [#allocation6 + $0x1], 0 }
   0xf   :  { %21 = vsyncpa [#allocation9], 0 }
  0x10   :  { %23 = vsyncpa [#allocation9 + $0x1], 0 }
  0x11   :  { %24 = vsyncpa [#allocation12], 0 }
  0x12   :  { %26 = vsyncpa [#allocation12 + $0x1], 0 }
  0x13   :  { %27 = vsyncpa [#allocation4], 0 }
  0x14   :  { %29 = vsyncpa [#allocation4 + $0x1], 0 }
  0x15   :  { %30 = vsyncpa [#allocation16], 0 }
  0x16   :  { %32 = vsyncpa [#allocation16 + $0x1], 0  ;;  %s2709_s30 = smov 0   ;;  %s2711_s10 = smov 0  }
  0x17   :  { %s2713_s11 = smov 0   ;;  %s2715_s12 = smov 0  }
  0x18   :  { %s2717_s13 = smov 0   ;;  %s2719_s14 = smov 0  }
  0x19   :  { %s2721_s15 = smov 0   ;;  %s2723_s16 = smov 0  }
  0x1a   :  { %s2725_s17 = smov 0   ;;  %s2727_s18 = smov 0  }
  0x1b   :  { %s2729_s19 = smov 0   ;;  %s2731_s20 = smov 0  }
  0x1c   :  { %s2733_s21 = smov 0   ;;  %s2735_s22 = smov 0  }
  0x1d   :  { %s2737_s23 = smov 0   ;;  %s2739_s24 = smov 0  }
  0x1e LB: > { %3802 = sst [smem:[#allocation24_spill]] %s2580_s30  ;;  %p3758_p0 = scmp.eq.s32.totalorder %s2640_s24, 0  ;;  %s2640_s24 = sphi %s2739_s24, %s38_s24   ;;  %s2636_s23 = sphi %s2737_s23, %s3902_s23   ;;  %s2632_s22 = sphi %s2735_s22, %s3894_s22   ;;  %s2628_s21 = sphi %s2733_s21, %s3901_s21   ;;  %s2624_s20 = sphi %s2731_s20, %s3900_s20   ;;  %s2620_s19 = sphi %s2729_s19, %s3892_s19   ;;  %s2616_s18 = sphi %s2727_s18, %s3899_s18   ;;  %s2612_s17 = sphi %s2725_s17, %s3891_s17   ;;  %s2608_s16 = sphi %s2723_s16, %s3890_s16   ;;  %s2604_s15 = sphi %s2721_s15, %s3889_s15   ;;  %s2600_s14 = sphi %s2719_s14, %s3888_s14   ;;  %s2596_s13 = sphi %s2717_s13, %s3898_s13   ;;  %s2592_s12 = sphi %s2715_s12, %s3886_s12   ;;  %s2588_s11 = sphi %s2713_s11, %s3897_s11   ;;  %s2584_s10 = sphi %s2711_s10, %s3896_s10   ;;  %s2580_s30 = sphi %s2709_s30, %s3885_s30  }
  0x1f   : > { %3803 = sst [smem:[#allocation25_spill]] %s2584_s10  ;;  %p99_p1 = scmp.ne.s32.totalorder %s2600_s14, %s2596_s13 }
  0x20   : > { %3804 = sst [smem:[#allocation26_spill]] %s2596_s13  ;;  %p3757_p2 = scmp.lt.s32.totalorder %s2640_s24, 8 }
  0x21   : > { %3805 = sst [smem:[#allocation27_spill]] %s2600_s14  ;;  %p101_p3 = por %p99_p1, %p3758_p0 }
  0x22   : > { %3806 = sst [smem:[#allocation28_spill]] %s2608_s16  ;;  %s2796_s25 = sand.u32 1, %s2640_s24  }
  0x23   : > { %3807 = sst [smem:[#allocation29_spill]] %s2612_s17  ;;  %s2799_s26 = sand.u32 1, %s2600_s14  }
  0x24   : > { %3808 = sst [smem:[#allocation30_spill]] %s2616_s18  ;;  %s2802_s27 = sshll.u32 %s2799_s26, 8 }
  0x25   : > { %3809 = sst [smem:[#allocation31_spill]] %s2620_s19  ;;  %s2805_s28 = sshll.u32 %s2632_s22, 7 }
  0x26   : > { %3810 = sst [smem:[#allocation32_spill]] %s2624_s20  ;;  %s3814_s1 = sld [smem:[#allocation45_spill]] }
  0x27   : > { %3811 = sst [smem:[#allocation33_spill]] %s2632_s22  ;;  %s377_s7 = scalar_lea.vmem [#allocation5], %s2802_s27 }
  0x28   : > { %3812 = sst [smem:[#allocation34_spill]] %s2802_s27  ;;  %s383_s20 = sshll.u32 %s377_s7, 4  ;;  %s2814_s20 = int_to_ptr.vmem [resolvable:$true] %s383_s20 }
  0x29   : > { %3813 = sst [smem:[#allocation35_spill]] %s2805_s28  ;;  %p2818_p4 = pnand %p3757_p2, %p101_p3 }
  0x2b   : > { %s3815_s19 = scalar_select %p2818_p4, 1, 0 }
  0x2c   : > { %s2811_s8 = scalar_lea.hbm %s3814_s1, %s2805_s28  ;;  %p2828_p7 = pneg %p2818_p4 }
  0x2d   : > { %s2196_s6 = scalar_lea.hbm %s2811_s8, 4096  ;;  %s2201_s4 = scalar_lea.hbm %s3814_s1, 8192 }
  0x2e   : > { %p2197_p6 = scmp.ne.s32.totalorder %s2811_s8, %s2196_s6  ;;  %p2202_p10 = scmp.lt.u32.totalorder %s2811_s8, %s3814_s1 }
  0x2f   : > { %p2203_p11 = scmp.lt.u32.totalorder %s2201_s4, %s2196_s6  ;;  %p2205_p13 = scmp.lt.u32.totalorder %s2196_s6, %s2811_s8 }
  0x30   : > { %p2199_p8 = pnand %p2828_p7, %p2197_p6 }
  0x31   : > { %p2204_p12 = por %p2203_p11, %p2202_p10 }
  0x32   : > { %p2200_p9 = pneg %p2199_p8 }
  0x33   : > { %p2206_p1 = por %p2205_p13, %p2204_p12 }
  0x35   : > { %p2207_p3 = pnand %p2206_p1, %p2200_p9 }
  0x37   : > { %2210 = shalt.err (!%p2207_p3)
}
  0x38   : > { %s2211_s18 = scalar_lea.vmem %s2814_s20, 4096  ;;  %s2642_s7 = smov [#allocation5]  }
  0x39   : > { %p2212_p6 = scmp.ne.s32.totalorder %s2814_s20, %s2211_s18  ;;  %s2216_s29 = sshll.u32 %s2642_s7, 4  ;;  %s2217_s29 = int_to_ptr.vmem [resolvable:$false] %s2216_s29 }
  0x3a   : > { %s2218_s0 = scalar_lea.vmem %s2217_s29, 8192  ;;  %p2219_p0 = scmp.lt.s32.totalorder %s2814_s20, %s2217_s29 }
  0x3b   : > { %p2214_p8 = pnand %p2212_p6, %p2828_p7  ;;  %p2220_p5 = scmp.lt.s32.totalorder %s2218_s0, %s2211_s18 }
  0x3d   : > { %p2215_p2 = pneg %p2214_p8  ;;  %p2221_p10 = por %p2220_p5, %p2219_p0 }
  0x3f   : > { %p2222_p11 = pnand %p2221_p10, %p2215_p2 }
  0x41   : > { %2225 = shalt.err (!%p2222_p11)
}
  0x42   : > { %s3761_s2 = smov 256   ;;  %s3763_s4 = smov 128  }
  0x43   : > { %s3765_s6 = smov 8   ;;  %s3817_s18 = scalar_lea.sflag [#allocation6], %s2796_s25 }
  0x44   : > { %2033 = dma.hbm_to_vmem [thread:$0]  (!%p2818_p4), %s2811_s8, 4096, %s2814_s20, %s3817_s18, %s3761_s2, %s3763_s4, %s3765_s6  }
  0x45   : > { %p482_p0 = scmp.lt.s32.totalorder %s2640_s24, 9  ;;  %s3818_s3 = sld [smem:[#allocation47_spill]] }
  0x46   : > { %p3819_p2 = scmp.ge.s32.totalorder %s2640_s24, 1  ;;  %s417_s30 = scalar_lea.vmem [#allocation8], %s2802_s27 }
  0x47   : > { %s423_s10 = sshll.u32 %s417_s30, 4  ;;  %s2873_s8 = sshll.u32 %s2632_s22, 4  ;;  %s2870_s10 = int_to_ptr.vmem [resolvable:$true] %s423_s10 }
  0x48   : > { %p2865_p5 = pnand %p3819_p2, %p482_p0  ;;  %s3770_s20 = scalar_lea.sflag [#allocation9], %s2796_s25 }
  0x4a   : > { %s3820_s1 = scalar_select %p2865_p5, 1, 0 }
  0x4b   : > { %s2861_s0 = scalar_lea.hbm %s3818_s3, %s2805_s28  ;;  %s2231_s2 = scalar_lea.hbm %s3818_s3, 8192 }
  0x4c   : > { %3821 = sst [smem:[#allocation36_spill]] %s3820_s1  ;;  %s2226_s18 = scalar_lea.hbm %s2861_s0, 4096 }
  0x4d   : > { %p2227_p9 = scmp.ne.s32.totalorder %s2861_s0, %s2226_s18  ;;  %p2232_p1 = scmp.lt.u32.totalorder %s2861_s0, %s3818_s3 }
  0x4e   : > { %p2233_p3 = scmp.lt.u32.totalorder %s2231_s2, %s2226_s18  ;;  %p2235_p8 = scmp.lt.u32.totalorder %s2226_s18, %s2861_s0 }
  0x4f   : > { %p2229_p12 = pnand %p2227_p9, %p2828_p7 }
  0x50   : > { %p2234_p6 = por %p2233_p3, %p2232_p1 }
  0x51   : > { %p2230_p13 = pneg %p2229_p12 }
  0x52   : > { %p2236_p10 = por %p2235_p8, %p2234_p6 }
  0x54   : > { %p2237_p11 = pnand %p2236_p10, %p2230_p13 }
  0x56   : > { %2240 = shalt.err (!%p2237_p11)
}
  0x57   : > { %s2241_s30 = scalar_lea.vmem %s2870_s10, 4096  ;;  %s2646_s7 = smov [#allocation8]  }
  0x58   : > { %p2242_p0 = scmp.ne.s32.totalorder %s2870_s10, %s2241_s30  ;;  %s2246_s29 = sshll.u32 %s2646_s7, 4  ;;  %s2247_s29 = int_to_ptr.vmem [resolvable:$false] %s2246_s29 }
  0x59   : > { %s2248_s4 = scalar_lea.vmem %s2247_s29, 8192  ;;  %p2249_p12 = scmp.lt.s32.totalorder %s2870_s10, %s2247_s29 }
  0x5a   : > { %p2244_p2 = pnand %p2242_p0, %p2828_p7  ;;  %p2250_p5 = scmp.lt.s32.totalorder %s2248_s4, %s2241_s30 }
  0x5c   : > { %p2245_p9 = pneg %p2244_p2  ;;  %p2251_p1 = por %p2250_p5, %p2249_p12 }
  0x5e   : > { %p2252_p3 = pnand %p2251_p1, %p2245_p9 }
  0x60   : > { %2255 = shalt.err (!%p2252_p3)
}
  0x61   : > { %s3822_s2 = smov 8   ;;  %s3823_s6 = smov 128  }
  0x62   : > { %s3824_s18 = smov 256   ;;  %s3825_s5 = sld [smem:[#allocation49_spill]] }
  0x63   : > { %2039 = dma.hbm_to_vmem [thread:$0]  (!%p2818_p4), %s2861_s0, 4096, %s2870_s10, %s3770_s20, %s3824_s18, %s3823_s6, %s3822_s2  }
  0x64   : > { %s453_s4 = scalar_lea.vmem [#allocation11], %s2799_s26 }
  0x65   : > { %s460_s3 = sshll.u32 %s453_s4, 4  ;;  %s461_s3 = int_to_ptr.vmem [resolvable:$true] %s460_s3 }
  0x68   : > { %s2906_s30 = scalar_lea.hbm %s3825_s5, %s2873_s8  ;;  %s2261_s0 = scalar_lea.hbm %s3825_s5, 32 }
  0x69   : > { %s2256_s27 = scalar_lea.hbm %s2906_s30, 16  ;;  %p2262_p8 = scmp.lt.u32.totalorder %s2906_s30, %s3825_s5 }
  0x6a   : > { %p2257_p5 = scmp.ne.s32.totalorder %s2906_s30, %s2256_s27  ;;  %p2263_p10 = scmp.lt.u32.totalorder %s2261_s0, %s2256_s27 }
  0x6b   : > { %p2265_p0 = scmp.lt.u32.totalorder %s2256_s27, %s2906_s30 }
  0x6c   : > { %p2259_p13 = pnand %p2257_p5, %p2828_p7  ;;  %p2264_p11 = por %p2263_p10, %p2262_p8 }
  0x6e   : > { %p2260_p6 = pneg %p2259_p13  ;;  %p2266_p2 = por %p2265_p0, %p2264_p11 }
  0x70   : > { %p2267_p9 = pnand %p2266_p2, %p2260_p6 }
  0x72   : > { %2270 = shalt.err (!%p2267_p9)
}
  0x73   : > { %s2271_s4 = scalar_lea.vmem %s461_s3, 16  ;;  %s2647_s20 = smov [#allocation11]  }
  0x74   : > { %p2272_p12 = scmp.ne.s32.totalorder %s461_s3, %s2271_s4  ;;  %s2276_s1 = sshll.u32 %s2647_s20, 4  ;;  %s2277_s1 = int_to_ptr.vmem [resolvable:$false] %s2276_s1 }
  0x75   : > { %s2278_s28 = scalar_lea.vmem %s2277_s1, 32  ;;  %p2279_p5 = scmp.lt.s32.totalorder %s461_s3, %s2277_s1 }
  0x76   : > { %p2274_p1 = pnand %p2272_p12, %p2828_p7  ;;  %p2280_p13 = scmp.lt.s32.totalorder %s2278_s28, %s2271_s4 }
  0x78   : > { %p2275_p3 = pneg %p2274_p1  ;;  %p2281_p4 = por %p2280_p13, %p2279_p5 }
  0x7a   : > { %p2282_p8 = pnand %p2281_p4, %p2275_p3 }
  0x7c   : > { %2285 = shalt.err (!%p2282_p8)
}
  0x7d   : > { %p3826_p10 = scmp.ne.s32.totalorder %s3815_s19, 0  ;;  %s3827_s27 = scalar_lea.sflag [#allocation12], %s2796_s25 }
  0x7e   : > { %s2930_s1 = sadd.s32 4294967295, %s2640_s24   ;;  %s50_s10 = sadd.s32 1, %s2628_s21 }
  0x7f   : > { %2045 = dma.hbm_to_vmem [thread:$0]  (!%p3826_p10), %s2906_s30, 16, %s461_s3, %s3827_s27  }
  0x80   : > { %p51_p4 = scmp.ge.s32.totalorder %s50_s10, 2  ;;  %s53_s0 = sadd.s32 1, %s2632_s22 }
  0x81   : > { %s57_s7 = sadd.s32 1, %s2636_s23  ;;  %s66_s29 = sadd.s32 1, %s2612_s17 }
  0x82   : > { %s3904_s10 = smov (%p51_p4, %s50_s10), 0  ;;  %s3906_s0 = smov (!%p51_p4, %s53_s0), %s2632_s22 }
  0x83   : > { %3828 = sst [smem:[#allocation37_spill]] %s3904_s10  ;;  %s62_s3 = ssub.s32 %s2628_s21, %s3904_s10 }
  0x84   : > { %p73_p6 = scmp.ne.s32.totalorder %s2612_s17, %s2608_s16  ;;  %p55_p11 = scmp.ge.s32.totalorder %s3906_s0, 2 }
  0x85   : > { %p79_p0 = scmp.ne.s32.totalorder %s2608_s16, %s2604_s15  ;;  %p3829_p2 = scmp.eq.s32.totalorder %s2640_s24, 0 }
  0x86   : > { %p80_p12 = scmp.eq.s32.totalorder %s2930_s1, 0  ;;  %s3908_s0 = smov (%p55_p11, %s3906_s0), 0 }
  0x87   : > { %p2948_p9 = por %p3829_p2, %p73_p6  ;;  %3831 = sst [smem:[#allocation38_spill]] %s3908_s0 }
  0x88   : > { %s3910_s7 = smov (!%p55_p11, %s57_s7), %s2636_s23  ;;  %s3832_s4 = sld [smem:[#allocation25_spill]] }
  0x89   : > { %p2956_p1 = por %p80_p12, %p79_p0  ;;  %s89_s27 = ssub.s32 %s2632_s22, %s3908_s0 }
  0x8a   : > { %p59_p3 = scmp.ge.s32.totalorder %s3910_s7, 2  ;;  %p90_p5 = scmp.eq.s32.totalorder %s89_s27, 0 }
  0x8b   : > { %s3833_s28 = scalar_select %p2956_p1, 1, 0 }
  0x8c   : > { %s3835_s15 = sld [smem:[#allocation24_spill]]  ;;  %s92_s20 = sadd.s32 1, %s2600_s14 }
  0x8d   : > { %3834 = sst [smem:[#allocation39_spill]] %s3833_s28  ;;  %p105_p13 = scmp.ne.s32.totalorder %s2596_s13, %s2592_s12 }
  0x8e   : > { %s3912_s7 = smov (%p59_p3, %s3910_s7), 0  ;;  %s252_s22 = sadd.s32 1, %s2588_s11 }
  0x8f   : > { %3836 = sst [smem:[#allocation40_spill]] %s3912_s7  ;;  %s61_s10 = ssub.s32 %s2636_s23, %s3912_s7 }
  0x90   : > { %s2968_s5 = scalar_select %p90_p5, %s2600_s14, %s92_s20  }
  0x91   : > { %p2972_p8 = por %p105_p13, %p80_p12  ;;  %s63_s0 = sor.u32 %s62_s3, %s61_s10 }
  0x92   : > { %3837 = sst [smem:[#allocation41_spill]] %s2968_s5  ;;  %p64_p4 = scmp.eq.s32.totalorder %s63_s0, 0 }
  0x93   : > { %s3838_s28 = scalar_select %p2972_p8, 1, 0 }
  0x94   : > { %s249_s16 = sor.u32 %s89_s27, %s63_s0  ;;  %p262_p11 = scmp.ne.s32.totalorder %s2588_s11, %s3832_s4 }
  0x95   : > { %p250_p6 = scmp.eq.s32.totalorder %s249_s16, 0  ;;  %p263_p0 = scmp.eq.s32.totalorder %s2930_s1, 7 }
  0x96   : > { %s2980_s12 = scalar_select %p64_p4, %s2612_s17, %s66_s29  }
  0x97   : > { %s2983_s13 = scalar_select %p250_p6, %s2588_s11, %s252_s22  }
  0x98   : > { %3839 = sst [smem:[#allocation42_spill]] %s2980_s12  ;;  %p268_p2 = scmp.ne.s32.totalorder %s3832_s4, %s3835_s15 }
  0x99   : > { %s3840_s20 = sadd.s32 4294967294, %s2640_s24   ;;  %s349_s7 = sand.u32 1, %s2612_s17  }
  0x9a   : > { %p269_p12 = scmp.eq.s32.totalorder %s3840_s20, 7  ;;  %p2991_p3 = por %p263_p0, %p262_p11 }
  0x9b   : > { %s1609_s16 = sshll.u32 %s349_s7, 8  ;;  %s1651_s0 = sshll.u32 %s2628_s21, 5 }
  0x9c   : > { %s3841_s5 = scalar_select %p2991_p3, 1, 0 }
  0x9d   : > { %p2995_p5 = por %p269_p12, %p268_p2  ;;  %s1612_s29 = sshll.u32 %s2636_s23, 6 }
  0x9e   : > { %3842 = sst [smem:[#allocation43_spill]] %s3841_s5  ;;  %s353_s3 = scalar_lea.vmem [#allocation2], %s1609_s16 }
  0x9f   : > { %s3843_s10 = scalar_select %p2995_p5, 1, 0 }
  0xa0   : > { %s363_s27 = sshll.u32 %s353_s3, 4  ;;  %s360_s22 = sadd.s32 %s1651_s0, %s1612_s29  ;;  %s3001_s27 = int_to_ptr.vmem [resolvable:$true] %s363_s27 }
  0xa1   : > { %s1613_s4 = sshll.u32 %s360_s22, 7  ;;  %p3844_p13 = scmp.lt.s32.totalorder %s2640_s24, 8 }
  0xa2   : > { %s3846_s17 = sld [smem:[#allocation44_spill]]  ;;  %s3016_s16 = scalar_lea.sflag [#allocation3], %s349_s7 }
  0xa3   : > { %p3007_p4 = pnand %p3844_p13, %p2948_p9 }
  0xa5   : > { %p2288_p9 = pneg %p3007_p4 }
  0xa8   : > { %s3847_s5 = smov %s3846_s17  ;;  %s3014_s14 = scalar_lea.hbm %s3846_s17, %s1613_s4 }
  0xa9   : > { %s2286_s0 = scalar_lea.hbm %s3014_s14, 4096  ;;  %s2291_s29 = scalar_lea.hbm %s3847_s5, 16384 }
  0xaa   : > { %p2287_p6 = scmp.ne.s32.totalorder %s3014_s14, %s2286_s0  ;;  %p2292_p2 = scmp.lt.u32.totalorder %s3014_s14, %s3847_s5 }
  0xab   : > { %p2293_p12 = scmp.lt.u32.totalorder %s2291_s29, %s2286_s0  ;;  %p2295_p5 = scmp.lt.u32.totalorder %s2286_s0, %s3014_s14 }
  0xac   : > { %p2289_p11 = pnand %p2288_p9, %p2287_p6 }
  0xad   : > { %p2294_p13 = por %p2293_p12, %p2292_p2 }
  0xae   : > { %p2290_p0 = pneg %p2289_p11 }
  0xaf   : > { %p2296_p3 = por %p2295_p5, %p2294_p13 }
  0xb1   : > { %p2297_p8 = pnand %p2296_p3, %p2290_p0 }
  0xb3   : > { %2300 = shalt.err (!%p2297_p8)
}
  0xb4   : > { %s2301_s7 = scalar_lea.vmem %s3001_s27, 4096  ;;  %s2648_s22 = smov [#allocation2]  }
  0xb5   : > { %p2302_p6 = scmp.ne.s32.totalorder %s3001_s27, %s2301_s7  ;;  %s2306_s4 = sshll.u32 %s2648_s22, 4  ;;  %s2307_s4 = int_to_ptr.vmem [resolvable:$false] %s2306_s4 }
  0xb6   : > { %s2308_s20 = scalar_lea.vmem %s2307_s4, 8192  ;;  %p2309_p10 = scmp.lt.s32.totalorder %s3001_s27, %s2307_s4 }
  0xb7   : > { %p2304_p11 = pnand %p2302_p6, %p2288_p9  ;;  %p2310_p2 = scmp.lt.s32.totalorder %s2308_s20, %s2301_s7 }
  0xb9   : > { %p2305_p1 = pneg %p2304_p11  ;;  %p2311_p12 = por %p2310_p2, %p2309_p10 }
  0xbb   : > { %p2312_p5 = pnand %p2311_p12, %p2305_p1 }
  0xbd   : > { %2315 = shalt.err (!%p2312_p5)
}
  0xbe   : > { %s2649_s0 = smov 16   ;;  %s3848_s30 = sld [smem:[#allocation35_spill]] }
  0xbf   : > { %s3849_s12 = sld [smem:[#allocation34_spill]]  ;;  %s3850_s3 = sld [smem:[#allocation46_spill]] }
  0xc0   : > { %2030 = dma.hbm_to_vmem [thread:$0]  (!%p3007_p4), %s3014_s14, 4096, %s3001_s27, %s3016_s16, %s3824_s18, %s3824_s18, %s2649_s0  }
  0xc5   : > { %s3050_s22 = scalar_lea.hbm %s3850_s3, %s3848_s30  ;;  %s397_s7 = scalar_lea.vmem [#allocation7], %s3849_s12 }
  0xc6   : > { %s403_s15 = sshll.u32 %s397_s7, 4  ;;  %s2316_s4 = scalar_lea.hbm %s3050_s22, 4096  ;;  %s3053_s15 = int_to_ptr.vmem [resolvable:$true] %s403_s15 }
  0xc7   : > { %p2317_p10 = scmp.ne.s32.totalorder %s3050_s22, %s2316_s4  ;;  %s2321_s27 = scalar_lea.hbm %s3850_s3, 8192 }
  0xc8   : > { %p2322_p3 = scmp.lt.u32.totalorder %s3050_s22, %s3850_s3  ;;  %p2323_p4 = scmp.lt.u32.totalorder %s2321_s27, %s2316_s4 }
  0xc9   : > { %p2319_p1 = pnand %p2317_p10, %p2828_p7  ;;  %p2325_p0 = scmp.lt.u32.totalorder %s2316_s4, %s3050_s22 }
  0xca   : > { %p2324_p9 = por %p2323_p4, %p2322_p3 }
  0xcb   : > { %p2320_p8 = pneg %p2319_p1 }
  0xcc   : > { %p2326_p13 = por %p2325_p0, %p2324_p9 }
  0xce   : > { %p2327_p6 = pnand %p2326_p13, %p2320_p8 }
  0xd0   : > { %2330 = shalt.err (!%p2327_p6)
}
  0xd1   : > { %s2331_s30 = scalar_lea.vmem %s3053_s15, 4096  ;;  %s2650_s12 = smov [#allocation7]  }
  0xd2   : > { %p2332_p11 = scmp.ne.s32.totalorder %s3053_s15, %s2331_s30  ;;  %s2336_s29 = sshll.u32 %s2650_s12, 4  ;;  %s2337_s29 = int_to_ptr.vmem [resolvable:$false] %s2336_s29 }
  0xd3   : > { %s2338_s17 = scalar_lea.vmem %s2337_s29, 8192  ;;  %p2339_p5 = scmp.lt.s32.totalorder %s3053_s15, %s2337_s29 }
  0xd4   : > { %p2334_p2 = pnand %p2332_p11, %p2828_p7  ;;  %p2340_p10 = scmp.lt.s32.totalorder %s2338_s17, %s2331_s30 }
  0xd6   : > { %p2335_p12 = pneg %p2334_p2  ;;  %p2341_p1 = por %p2340_p10, %p2339_p5 }
  0xd8   : > { %p2342_p3 = pnand %p2341_p1, %p2335_p12 }
  0xda   : > { %2345 = shalt.err (!%p2342_p3)
}
  0xdb   : > { %p3851_p8 = scmp.ne.s32.totalorder %s3815_s19, 0  ;;  %s3852_s7 = scalar_lea.sflag [#allocation6], %s2796_s25 }
  0xdc   : > { %s3853_s14 = sld [smem:[#allocation48_spill]]  ;;  %s436_s0 = scalar_lea.vmem [#allocation10], %s2799_s26 }
  0xdd   : > { %2036 = dma.hbm_to_vmem [thread:$0]  (!%p3851_p8), %s3050_s22, 4096, %s3053_s15, %s3852_s7, %s3824_s18, %s3823_s6, %s3822_s2  }
  0xde   : > { %s443_s30 = sshll.u32 %s436_s0, 4  ;;  %s444_s30 = int_to_ptr.vmem [resolvable:$true] %s443_s30 }
  0xe2   : > { %s3854_s27 = smov %s3853_s14  ;;  %s3085_s16 = scalar_lea.hbm %s3853_s14, %s2873_s8 }
  0xe3   : > { %s2346_s12 = scalar_lea.hbm %s3085_s16, 16  ;;  %s2351_s2 = scalar_lea.hbm %s3854_s27, 32 }
  0xe4   : > { %p2347_p4 = scmp.ne.s32.totalorder %s3085_s16, %s2346_s12  ;;  %p2352_p13 = scmp.lt.u32.totalorder %s3085_s16, %s3854_s27 }
  0xe5   : > { %p2353_p6 = scmp.lt.u32.totalorder %s2351_s2, %s2346_s12  ;;  %p2355_p2 = scmp.lt.u32.totalorder %s2346_s12, %s3085_s16 }
  0xe6   : > { %p2349_p9 = pnand %p2347_p4, %p2828_p7 }
  0xe7   : > { %p2354_p11 = por %p2353_p6, %p2352_p13 }
  0xe8   : > { %p2350_p0 = pneg %p2349_p9 }
  0xe9   : > { %p2356_p12 = por %p2355_p2, %p2354_p11 }
  0xeb   : > { %p2357_p5 = pnand %p2356_p12, %p2350_p0 }
  0xed   : > { %2360 = shalt.err (!%p2357_p5)
}
  0xee   : > { %s2361_s22 = scalar_lea.vmem %s444_s30, 16  ;;  %s2651_s15 = smov [#allocation10]  }
  0xef   : > { %p2362_p10 = scmp.ne.s32.totalorder %s444_s30, %s2361_s22  ;;  %s2366_s7 = sshll.u32 %s2651_s15, 4  ;;  %s2367_s7 = int_to_ptr.vmem [resolvable:$false] %s2366_s7 }
  0xf0   : > { %s2368_s4 = scalar_lea.vmem %s2367_s7, 32  ;;  %p2369_p4 = scmp.lt.s32.totalorder %s444_s30, %s2367_s7 }
  0xf1   : > { %p2364_p1 = pnand %p2362_p10, %p2828_p7  ;;  %p2370_p9 = scmp.lt.s32.totalorder %s2368_s4, %s2361_s22 }
  0xf3   : > { %p2365_p3 = pneg %p2364_p1  ;;  %p2371_p8 = por %p2370_p9, %p2369_p4 }
  0xf5   : > { %p2372_p6 = pnand %p2371_p8, %p2365_p3 }
  0xf7   : > { %2375 = shalt.err (!%p2372_p6)
}
  0xf8   : > { %p3855_p13 = scmp.ne.s32.totalorder %s3815_s19, 0  ;;  %s3856_s20 = scalar_lea.sflag [#allocation9], %s2796_s25 }
  0xf9   : > { %s3857_s12 = sld [smem:[#allocation50_spill]]  ;;  %s470_s2 = scalar_lea.vmem [#allocation13], %s2799_s26 }
  0xfa   : > { %2042 = dma.hbm_to_vmem [thread:$0]  (!%p3855_p13), %s3085_s16, 16, %s444_s30, %s3856_s20  }
  0xfb   : > { %s477_s6 = sshll.u32 %s470_s2, 4  ;;  %s478_s6 = int_to_ptr.vmem [resolvable:$true] %s477_s6 }
  0xff   : > { %s3858_s29 = smov %s3857_s12  ;;  %s3111_s17 = scalar_lea.hbm %s3857_s12, %s2873_s8 }
 0x100   : > { %s2376_s18 = scalar_lea.hbm %s3111_s17, 16  ;;  %s2381_s16 = scalar_lea.hbm %s3858_s29, 32 }
 0x101   : > { %p2377_p8 = scmp.ne.s32.totalorder %s3111_s17, %s2376_s18  ;;  %p2382_p2 = scmp.lt.u32.totalorder %s3111_s17, %s3858_s29 }
 0x102   : > { %p2383_p12 = scmp.lt.u32.totalorder %s2381_s16, %s2376_s18  ;;  %p2385_p10 = scmp.lt.u32.totalorder %s2376_s18, %s3111_s17 }
 0x103   : > { %p2379_p0 = pnand %p2377_p8, %p2828_p7 }
 0x104   : > { %p2384_p5 = por %p2383_p12, %p2382_p2 }
 0x105   : > { %p2380_p11 = pneg %p2379_p0 }
 0x106   : > { %p2386_p1 = por %p2385_p10, %p2384_p5 }
 0x108   : > { %p2387_p3 = pnand %p2386_p1, %p2380_p11 }
 0x10a   : > { %2390 = shalt.err (!%p2387_p3)
}
 0x10b   : > { %s2391_s26 = scalar_lea.vmem %s478_s6, 16  ;;  %s2652_s8 = smov [#allocation13]  }
 0x10c   : > { %p2392_p4 = scmp.ne.s32.totalorder %s478_s6, %s2391_s26  ;;  %s2396_s4 = sshll.u32 %s2652_s8, 4  ;;  %s2397_s4 = int_to_ptr.vmem [resolvable:$false] %s2396_s4 }
 0x10d   : > { %s2398_s20 = scalar_lea.vmem %s2397_s4, 32  ;;  %p2399_p8 = scmp.lt.s32.totalorder %s478_s6, %s2397_s4 }
 0x10e   : > { %p2394_p9 = pnand %p2392_p4, %p2828_p7  ;;  %p2400_p0 = scmp.lt.s32.totalorder %s2398_s20, %s2391_s26 }
 0x110   : > { %p2395_p6 = pneg %p2394_p9  ;;  %p2401_p13 = por %p2400_p0, %p2399_p8 }
 0x112   : > { %p2402_p2 = pnand %p2401_p13, %p2395_p6 }
 0x114   : > { %2405 = shalt.err (!%p2402_p2)
}
 0x115   : > { %p3859_p12 = scmp.ne.s32.totalorder %s3815_s19, 0  ;;  %s3860_s14 = scalar_lea.sflag [#allocation12], %s2796_s25 }
 0x116   : > { %s3861_s0 = sld [smem:[#allocation36_spill]] }
 0x117   : > { %2048 = dma.hbm_to_vmem [thread:$0]  (!%p3859_p12), %s3111_s17, 16, %s478_s6, %s3860_s14  }
 0x11c   : > { %p3862_p11 = scmp.ne.s32.totalorder %s3861_s0, 0 }
 0x11d   : > { %s3863_s9 = sld [smem:[#allocation28_spill]] (!%p3862_p11)  ;;  %s3864_s12 = sld [smem:[#allocation39_spill]] (!%p3862_p11) }
 0x11e   : > { %486 = sbr.rel (%p3862_p11) target bundleno = 692 (0x2b4), region = 48 }
 0x123   : > { %s488_s2 = sand.u32 (!%p3862_p11), 1, %s3863_s9   ;;  %p3865_p7 = scmp.ne.s32.totalorder (!%p3862_p11), %s3864_s12, 0 }
 0x124   : > { %s1624_s18 = sshll.u32 (!%p3862_p11), %s488_s2, 8  ;;  %s489_s22 = scalar_lea.sflag (!%p3862_p11), [#allocation3], %s488_s2 }
 0x125   : > { %s3136_s15 = scalar_lea.vmem [#allocation2], %s1624_s18 }
 0x126   : > { %2555 = dma.done.wait (%p3865_p7), %s489_s22, 4096  }
 0x127   : > { %2557 = vsyncadd (%p3865_p7), %s489_s22, 4294963200  ;;  %s3866_s19 = sld [smem:[#allocation26_spill]]  ;;  %s3143_s25 = sand.u32 1, %s2930_s1  }
 0x128   : > { %s498_s16 = scalar_lea.sflag [#allocation6], %s3143_s25  ;;  %p3867_p13 = scmp.ne.s32.totalorder %s3838_s28, 0 }
 0x12d   : > { %s3146_s17 = sand.u32 1, %s3866_s19  }
 0x12e   : > { %s1625_s6 = sshll.u32 %s3146_s17, 8 }
 0x12f   : > { %s3150_s30 = scalar_lea.vmem [#allocation5], %s1625_s6 }
 0x130   : > { %2559 = dma.done.wait (%p3867_p13), %s498_s16, 8192  }
 0x131   : > { %2561 = vsyncadd (%p3867_p13), %s498_s16, 4294959104  ;;  %s3156_s7 = scalar_lea.vmem [#allocation7], %s1625_s6  ;;  %s516_s26 = scalar_lea.sflag [#allocation9], %s3143_s25 }
 0x132   : > { %s3159_s1 = scalar_lea.vmem [#allocation8], %s1625_s6 }
 0x133   : > { %2563 = dma.done.wait (%p3867_p13), %s516_s26, 4112  }
 0x134   : > { %2565 = vsyncadd (%p3867_p13), %s516_s26, 4294963184  ;;  %s527_s8 = scalar_lea.vmem [#allocation10], %s3146_s17  ;;  %s533_s4 = scalar_lea.sflag [#allocation12], %s3143_s25 }
 0x135   : > { %s535_s20 = scalar_lea.vmem [#allocation11], %s3146_s17 }
 0x136   : > { %2567 = dma.done.wait (%p3867_p13), %s533_s4, 32  }
 0x137   : > { %2569 = vsyncadd (%p3867_p13), %s533_s4, 4294967264  ;;  %v667_v0 = vld [vmem:[%s3150_s30 + $0x80] sm:$0xff]  ;;  %v668_v1 = vld [vmem:[%s3150_s30 + $0x88] sm:$0xff]  ;;  %s3868_s28 = sld [smem:[#allocation25_spill]]  ;;  %s3869_s12 = sld [smem:[#allocation30_spill]] }
 0x138   : > { %v651_v2 = vld [vmem:[%s3150_s30] sm:$0xff]  ;;  %v1895_v3 = vpack.c.bf16 %v668_v1, %v667_v0  ;;  %v652_v4 = vld [vmem:[%s3150_s30 + $0x8] sm:$0xff]  ;;  %v669_v5 = vld [vmem:[%s3150_s30 + $0x90] sm:$0xff]  ;;  %s3870_s2 = sld [smem:[#allocation31_spill]]  ;;  %s3871_s18 = sld [smem:[#allocation32_spill]] }
 0x139   : > { %v670_v6 = vld [vmem:[%s3150_s30 + $0x98] sm:$0xff]  ;;  %v1897_v7 = vpack.c.bf16 %v652_v4, %v651_v2  ;;  %v653_v9 = vld [vmem:[%s3150_s30 + $0x10] sm:$0xff]  ;;  %v671_v11 = vld [vmem:[%s3150_s30 + $0xa0] sm:$0xff] }
 0x13a   : > { %v1899_v8 = vpack.c.bf16 %v670_v6, %v669_v5  ;;  %v654_v10 = vld [vmem:[%s3150_s30 + $0x18] sm:$0xff]  ;;  %1991 = vmatprep.subr.bf16.mxu1 %v1895_v3  ;;  %1896 = vmatprep.subr.bf16.mxu0 %v1895_v3  ;;  %v672_v12 = vld [vmem:[%s3150_s30 + $0xa8] sm:$0xff]  ;;  %v655_v15 = vld [vmem:[%s3150_s30 + $0x20] sm:$0xff] }
 0x13b   : > { %1999 = vmatpush3.bf16.msra.mxu1 %v1897_v7  ;;  %1898 = vmatpush3.bf16.msra.mxu0 %v1897_v7  ;;  %v1901_v13 = vpack.c.bf16 %v654_v10, %v653_v9  ;;  %v1903_v14 = vpack.c.bf16 %v672_v12, %v671_v11  ;;  %v656_v16 = vld [vmem:[%s3150_s30 + $0x28] sm:$0xff]  ;;  %v673_v17 = vld [vmem:[%s3150_s30 + $0xb0] sm:$0xff]  ;;  %v674_v18 = vld [vmem:[%s3150_s30 + $0xb8] sm:$0xff] }
 0x13c   : > { %1992 = vmatprep.subr.bf16.mxu1 %v1899_v8  ;;  %1900 = vmatprep.subr.bf16.mxu0 %v1899_v8  ;;  %v1905_v19 = vpack.c.bf16 %v656_v16, %v655_v15  ;;  %v1907_v20 = vpack.c.bf16 %v674_v18, %v673_v17  ;;  %v657_v21 = vld [vmem:[%s3150_s30 + $0x30] sm:$0xff]  ;;  %v658_v22 = vld [vmem:[%s3150_s30 + $0x38] sm:$0xff]  ;;  %v675_v23 = vld [vmem:[%s3150_s30 + $0xc0] sm:$0xff] }
 0x13d   : > { %v676_v24 = vld [vmem:[%s3150_s30 + $0xc8] sm:$0xff]  ;;  %v1909_v27 = vpack.c.bf16 %v658_v22, %v657_v21  ;;  %v659_v29 = vld [vmem:[%s3150_s30 + $0x40] sm:$0xff]  ;;  %v677_v31 = vld [vmem:[%s3150_s30 + $0xd0] sm:$0xff]  ;;  %s598_s14 = sand.u32 1, %s3868_s28   ;;  %s1652_s22 = sshll.u32 %s3869_s12, 5 }
 0x13e   : > { %v3191_v25 = vld [vmem:[%s3136_s15 + $0x88] sm:$0xff]  ;;  %v1911_v28 = vpack.c.bf16 %v676_v24, %v675_v23  ;;  %v678_v32 = vld [vmem:[%s3150_s30 + $0xd8] sm:$0xff]  ;;  %v661_v35 = vld [vmem:[%s3150_s30 + $0x50] sm:$0xff]  ;;  %s3448_s0 = sshll.u32 %s598_s14, 7  ;;  %s1639_s19 = sshll.u32 %s3871_s18, 6 }
 0x13f   : > { %2000 = vmatpush3.bf16.msra.mxu1 %v1901_v13  ;;  %1902 = vmatpush3.bf16.msra.mxu0 %v1901_v13  ;;  %v3195_v26 = vld [vmem:[%s3136_s15 + $0x8] sm:$0xff]  ;;  %v1915_v34 = vpack.c.bf16 %v678_v32, %v677_v31  ;;  %v662_v36 = vld [vmem:[%s3150_s30 + $0x58] sm:$0xff]  ;;  %v679_v37 = vld [vmem:[%s3150_s30 + $0xe0] sm:$0xff]  ;;  %s3457_s9 = scalar_lea.vmem [#allocation14], %s3448_s0  ;;  %s543_s12 = scalar_lea.vmem [#allocation13], %s3146_s17 }
 0x140   : > { %1993 = vmatprep.subr.bf16.mxu1 %v1903_v14  ;;  %1904 = vmatprep.subr.bf16.mxu0 %v1903_v14  ;;  %v660_v30 = vld [vmem:[%s3150_s30 + $0x48] sm:$0xff]  ;;  %v1917_v39 = vpack.c.bf16 %v662_v36, %v661_v35  ;;  %v663_v41 = vld [vmem:[%s3150_s30 + $0x60] sm:$0xff]  ;;  %v681_v43 = vld [vmem:[%s3150_s30 + $0xf0] sm:$0xff] }
 0x141   : > { %794 = vmatprep.mubr.f32.mxu1 %v3191_v25  ;;  %754 = vmatprep.mubr.f32.mxu0 %v3195_v26  ;;  %v1913_v33 = vpack.c.bf16 %v660_v30, %v659_v29  ;;  %v680_v38 = vld [vmem:[%s3150_s30 + $0xe8] sm:$0xff]  ;;  %v682_v44 = vld [vmem:[%s3150_s30 + $0xf8] sm:$0xff]  ;;  %v665_v47 = vld [vmem:[%s3150_s30 + $0x70] sm:$0xff] }
 0x142   : > { %v1919_v40 = vpack.c.bf16 %v680_v38, %v679_v37  ;;  %v664_v42 = vld [vmem:[%s3150_s30 + $0x68] sm:$0xff]  ;;  %v1923_v46 = vpack.c.bf16 %v682_v44, %v681_v43  ;;  %v666_v48 = vld [vmem:[%s3150_s30 + $0x78] sm:$0xff]  ;;  %v867_v49 = vld [vmem:[%s3156_s7 + $0x80] sm:$0xff]  ;;  %s1279_s30 = sshll.u32 %s3457_s9, 4  ;;  %s3499_s30 = int_to_ptr.vmem [resolvable:$true] %s1279_s30 }
 0x143   : > { %2001 = vmatpush3.bf16.msra.mxu1 %v1905_v19  ;;  %1906 = vmatpush3.bf16.msra.mxu0 %v1905_v19  ;;  %v1921_v45 = vpack.c.bf16 %v664_v42, %v663_v41  ;;  %v868_v50 = vld [vmem:[%s3156_s7 + $0x88] sm:$0xff]  ;;  %v1067_v51 = vld [vmem:[%s3159_s1 + $0x80] sm:$0xff]  ;;  %v1925_v53 = vpack.c.bf16 %v666_v48, %v665_v47  ;;  %v869_v60 = vld [vmem:[%s3156_s7 + $0x90] sm:$0xff]  ;;  %s2406_s18 = scalar_lea.vmem %s3499_s30, 2048 }
 0x144   : > { %1994 = vmatprep.subr.bf16.mxu1 %v1907_v20  ;;  %1908 = vmatprep.subr.bf16.mxu0 %v1907_v20  ;;  %v1068_v52 = vld [vmem:[%s3159_s1 + $0x88] sm:$0xff]  ;;  %v851_v54 = vld [vmem:[%s3156_s7] sm:$0xff]  ;;  %v1927_v55 = vpack.c.bf16 %v868_v50, %v867_v49  ;;  %v870_v61 = vld [vmem:[%s3156_s7 + $0x98] sm:$0xff]  ;;  %p2407_p5 = scmp.ne.s32.totalorder %s3499_s30, %s2406_s18 }
 0x145   : > { %v852_v56 = vld [vmem:[%s3156_s7 + $0x8] sm:$0xff]  ;;  %v1959_v57 = vpack.c.bf16 %v1068_v52, %v1067_v51  ;;  %v1051_v58 = vld [vmem:[%s3159_s1] sm:$0xff]  ;;  %v1069_v62 = vld [vmem:[%s3159_s1 + $0x90] sm:$0xff]  ;;  %v1931_v10 = vpack.c.bf16 %v870_v61, %v869_v60 }
 0x146   : > { %v1052_v59 = vld [vmem:[%s3159_s1 + $0x8] sm:$0xff]  ;;  %v1070_v63 = vld [vmem:[%s3159_s1 + $0x98] sm:$0xff]  ;;  %v3225_v0 = vld [vmem:[%s3136_s15 + $0x80] sm:$0xff]  ;;  %v1929_v2 = vpack.c.bf16 %v852_v56, %v851_v54 }
 0x147   : > { %2002 = vmatpush3.bf16.msra.mxu1 %v1909_v27  ;;  %1910 = vmatpush3.bf16.msra.mxu0 %v1909_v27  ;;  %v3228_v1 = vld [vmem:[%s3136_s15] sm:$0xff]  ;;  %v1961_v3 = vpack.c.bf16 %v1052_v59, %v1051_v58  ;;  %v853_v4 = vld [vmem:[%s3156_s7 + $0x10] sm:$0xff]  ;;  %v854_v5 = vld [vmem:[%s3156_s7 + $0x18] sm:$0xff]  ;;  %v1963_v11 = vpack.c.bf16 %v1070_v63, %v1069_v62 }
 0x148   : > { %1995 = vmatprep.subr.bf16.mxu1 %v1911_v28  ;;  %1912 = vmatprep.subr.bf16.mxu0 %v1911_v28  ;;  %v1053_v6 = vld [vmem:[%s3159_s1 + $0x10] sm:$0xff]  ;;  %v1054_v7 = vld [vmem:[%s3159_s1 + $0x18] sm:$0xff]  ;;  %v871_v12 = vld [vmem:[%s3156_s7 + $0xa0] sm:$0xff]  ;;  %v1933_v18 = vpack.c.bf16 %v854_v5, %v853_v4 }
 0x149   : > { %v3235_v8 = vld [vmem:[%s3136_s15 + $0x98] sm:$0xff]  ;;  %v872_v13 = vld [vmem:[%s3156_s7 + $0xa8] sm:$0xff]  ;;  %v1071_v14 = vld [vmem:[%s3159_s1 + $0xa0] sm:$0xff]  ;;  %v1965_v19 = vpack.c.bf16 %v1054_v7, %v1053_v6 }
 0x14a   : > { %v3238_v9 = vld [vmem:[%s3136_s15 + $0x18] sm:$0xff]  ;;  %v1072_v15 = vld [vmem:[%s3159_s1 + $0xa8] sm:$0xff]  ;;  %v3247_v16 = vld [vmem:[%s3136_s15 + $0x90] sm:$0xff]  ;;  %v1935_v28 = vpack.c.bf16 %v872_v13, %v871_v12 }
 0x14b   : > { %2003 = vmatpush3.bf16.msra.mxu1 %v1913_v33  ;;  %1914 = vmatpush3.bf16.msra.mxu0 %v1913_v33  ;;  %v3250_v17 = vld [vmem:[%s3136_s15 + $0x10] sm:$0xff]  ;;  %v855_v20 = vld [vmem:[%s3156_s7 + $0x20] sm:$0xff]  ;;  %v856_v21 = vld [vmem:[%s3156_s7 + $0x28] sm:$0xff]  ;;  %v1967_v29 = vpack.c.bf16 %v1072_v15, %v1071_v14 }
 0x14c   : > { %1996 = vmatprep.subr.bf16.mxu1 %v1915_v34  ;;  %1916 = vmatprep.subr.bf16.mxu0 %v1915_v34  ;;  %v1055_v22 = vld [vmem:[%s3159_s1 + $0x20] sm:$0xff]  ;;  %v1056_v23 = vld [vmem:[%s3159_s1 + $0x28] sm:$0xff]  ;;  %v873_v30 = vld [vmem:[%s3156_s7 + $0xb0] sm:$0xff]  ;;  %v1937_v36 = vpack.c.bf16 %v856_v21, %v855_v20 }
 0x14d   : > { %v3259_v24 = vld [vmem:[%s3136_s15 + $0xa8] sm:$0xff]  ;;  %v874_v31 = vld [vmem:[%s3156_s7 + $0xb8] sm:$0xff]  ;;  %v1073_v32 = vld [vmem:[%s3159_s1 + $0xb0] sm:$0xff]  ;;  %v1969_v37 = vpack.c.bf16 %v1056_v23, %v1055_v22 }
 0x14e   : > { %v3262_v27 = vld [vmem:[%s3136_s15 + $0x28] sm:$0xff]  ;;  %v1074_v33 = vld [vmem:[%s3159_s1 + $0xb8] sm:$0xff]  ;;  %v3271_v34 = vld [vmem:[%s3136_s15 + $0xa0] sm:$0xff]  ;;  %v1939_v44 = vpack.c.bf16 %v874_v31, %v873_v30 }
 0x14f   : > { %2004 = vmatpush3.bf16.msra.mxu1 %v1917_v39  ;;  %1918 = vmatpush3.bf16.msra.mxu0 %v1917_v39  ;;  %v3274_v35 = vld [vmem:[%s3136_s15 + $0x20] sm:$0xff]  ;;  %v857_v38 = vld [vmem:[%s3156_s7 + $0x30] sm:$0xff]  ;;  %v858_v39 = vld [vmem:[%s3156_s7 + $0x38] sm:$0xff] }
 0x150   : > { %1997 = vmatprep.subr.bf16.mxu1 %v1919_v40  ;;  %1920 = vmatprep.subr.bf16.mxu0 %v1919_v40  ;;  %v1057_v40 = vld [vmem:[%s3159_s1 + $0x30] sm:$0xff]  ;;  %v1058_v41 = vld [vmem:[%s3159_s1 + $0x38] sm:$0xff]  ;;  %v876_v47 = vld [vmem:[%s3156_s7 + $0xc8] sm:$0xff]  ;;  %v1941_v52 = vpack.c.bf16 %v858_v39, %v857_v38 }
 0x151   : > { %v3283_v42 = vld [vmem:[%s3136_s15 + $0xb8] sm:$0xff]  ;;  %v1075_v48 = vld [vmem:[%s3159_s1 + $0xc0] sm:$0xff]  ;;  %v1076_v49 = vld [vmem:[%s3159_s1 + $0xc8] sm:$0xff] }
 0x152   : > { %v3286_v43 = vld [vmem:[%s3136_s15 + $0x38] sm:$0xff]  ;;  %v3295_v50 = vld [vmem:[%s3136_s15 + $0xb0] sm:$0xff]  ;;  %v859_v54 = vld [vmem:[%s3156_s7 + $0x40] sm:$0xff]  ;;  %v1975_v61 = vpack.c.bf16 %v1076_v49, %v1075_v48 }
 0x153   : > { %2005 = vmatpush3.bf16.msra.mxu1 %v1921_v45  ;;  %1922 = vmatpush3.bf16.msra.mxu0 %v1921_v45  ;;  %v1971_v45 = vpack.c.bf16 %v1074_v33, %v1073_v32  ;;  %v3298_v51 = vld [vmem:[%s3136_s15 + $0x30] sm:$0xff]  ;;  %v1059_v56 = vld [vmem:[%s3159_s1 + $0x40] sm:$0xff]  ;;  %v3307_v58 = vld [vmem:[%s3136_s15 + $0xc8] sm:$0xff] }
 0x154   : > { %1998 = vmatprep.subr.bf16.mxu1 %v1923_v46  ;;  %1924 = vmatprep.subr.bf16.mxu0 %v1923_v46  ;;  %v875_v46 = vld [vmem:[%s3156_s7 + $0xc0] sm:$0xff]  ;;  %v3310_v59 = vld [vmem:[%s3136_s15 + $0x48] sm:$0xff]  ;;  %v877_v62 = vld [vmem:[%s3156_s7 + $0xd0] sm:$0xff] }
 0x155   : > { %v1943_v60 = vpack.c.bf16 %v876_v47, %v875_v46  ;;  %v878_v63 = vld [vmem:[%s3156_s7 + $0xd8] sm:$0xff]  ;;  %v3319_v4 = vld [vmem:[%s3136_s15 + $0xc0] sm:$0xff]  ;;  %v1061_v12 = vld [vmem:[%s3159_s1 + $0x50] sm:$0xff] }
 0x156   : > { %v3322_v5 = vld [vmem:[%s3136_s15 + $0x40] sm:$0xff]  ;;  %v1062_v13 = vld [vmem:[%s3159_s1 + $0x58] sm:$0xff]  ;;  %v880_v21 = vld [vmem:[%s3156_s7 + $0xe8] sm:$0xff] }
 0x157   : > { %2006 = vmatpush3.bf16.msra.mxu1 %v1925_v53  ;;  %1926 = vmatpush3.bf16.msra.mxu0 %v1925_v53  ;;  %v1973_v53 = vpack.c.bf16 %v1058_v41, %v1057_v40  ;;  %v3331_v14 = vld [vmem:[%s3136_s15 + $0xd8] sm:$0xff]  ;;  %v879_v20 = vld [vmem:[%s3156_s7 + $0xe0] sm:$0xff]  ;;  %v1080_v23 = vld [vmem:[%s3159_s1 + $0xe8] sm:$0xff]  ;;  %v1981_v31 = vpack.c.bf16 %v1062_v13, %v1061_v12 }
 0x158   : > { %1928 = vmatprep.subr.bf16.mxu1 %v1927_v55  ;;  %1960 = vmatprep.subr.bf16.mxu0 %v1959_v57  ;;  %v860_v55 = vld [vmem:[%s3156_s7 + $0x48] sm:$0xff]  ;;  %v3334_v15 = vld [vmem:[%s3136_s15 + $0x58] sm:$0xff]  ;;  %v1079_v22 = vld [vmem:[%s3159_s1 + $0xe0] sm:$0xff]  ;;  %v1951_v40 = vpack.c.bf16 %v880_v21, %v879_v20 }
 0x159   : > { %v1060_v57 = vld [vmem:[%s3159_s1 + $0x48] sm:$0xff]  ;;  %v1945_v6 = vpack.c.bf16 %v860_v55, %v859_v54  ;;  %v863_v32 = vld [vmem:[%s3156_s7 + $0x60] sm:$0xff]  ;;  %v1983_v41 = vpack.c.bf16 %v1080_v23, %v1079_v22  ;;  %v1081_v46 = vld [vmem:[%s3159_s1 + $0xf0] sm:$0xff] }
 0x15a   : > { %795 = vmatmul.mubr.f32.vlgmr.msra.gmra.mrb[0].mxu1 %v3225_v0  ;;  %755 = vmatmul.mubr.f32.vlgmr.msra.gmra.mrb[0].mxu0 %v3228_v1  ;;  %v1977_v7 = vpack.c.bf16 %v1060_v57, %v1059_v56  ;;  %v864_v33 = vld [vmem:[%s3156_s7 + $0x68] sm:$0xff]  ;;  %v1082_v47 = vld [vmem:[%s3159_s1 + $0xf8] sm:$0xff]  ;;  %v3367_v48 = vld [vmem:[%s3136_s15 + $0xe0] sm:$0xff] }
 0x15b   : > { %1930 = vmatpush3.bf16.msra.mxu1 %v1929_v2  ;;  %1962 = vmatpush3.bf16.msra.mxu0 %v1961_v3  ;;  %v1077_v2 = vld [vmem:[%s3159_s1 + $0xd0] sm:$0xff]  ;;  %v1078_v3 = vld [vmem:[%s3159_s1 + $0xd8] sm:$0xff]  ;;  %v3355_v38 = vld [vmem:[%s3136_s15 + $0xe8] sm:$0xff] }
 0x15c   : > { %799 = vmatprep.mubr.f32.mxu1 %v3235_v8  ;;  %759 = vmatprep.mubr.f32.mxu0 %v3238_v9  ;;  %v3358_v39 = vld [vmem:[%s3136_s15 + $0x68] sm:$0xff]  ;;  %v631_v49 = vld [vmem:[%s3136_s15 + $0x60] sm:$0xff]  ;;  %v865_v54 = vld [vmem:[%s3156_s7 + $0x70] sm:$0xff] }
 0x15d   : > { %1932 = vmatprep.subr.bf16.mxu1 %v1931_v10  ;;  %1964 = vmatprep.subr.bf16.mxu0 %v1963_v11  ;;  %v861_v10 = vld [vmem:[%s3156_s7 + $0x50] sm:$0xff]  ;;  %v862_v11 = vld [vmem:[%s3156_s7 + $0x58] sm:$0xff] }
 0x15e   : > { %800 = vmatmul.mubr.f32.gmra.mrb[2].mxu1 %v3247_v16  ;;  %760 = vmatmul.mubr.f32.gmra.mrb[2].mxu0 %v3250_v17  ;;  %v1949_v30 = vpack.c.bf16 %v862_v11, %v861_v10  ;;  %v866_v55 = vld [vmem:[%s3156_s7 + $0x78] sm:$0xff]  ;;  %v1065_v56 = vld [vmem:[%s3159_s1 + $0x70] sm:$0xff] }
 0x15f   : > { %1934 = vmatpush3.bf16.msra.mxu1 %v1933_v18  ;;  %1966 = vmatpush3.bf16.msra.mxu0 %v1965_v19  ;;  %v1947_v18 = vpack.c.bf16 %v878_v63, %v877_v62  ;;  %v1979_v19 = vpack.c.bf16 %v1078_v3, %v1077_v2  ;;  %v1066_v57 = vld [vmem:[%s3159_s1 + $0x78] sm:$0xff]  ;;  %v1987_v63 = vpack.c.bf16 %v1082_v47, %v1081_v46  ;;  %v3382_v2 = vld [vmem:[%s3136_s15 + $0xf0] sm:$0xff] }
 0x160   : > { %804 = vmatprep.mubr.f32.mxu1 %v3259_v24  ;;  %764 = vmatprep.mubr.f32.mxu0 %v3262_v27  ;;  %v633_v3 = vld [vmem:[%s3136_s15 + $0x70] sm:$0xff] }
 0x161   : > { %1936 = vmatprep.subr.bf16.mxu1 %v1935_v28  ;;  %1968 = vmatprep.subr.bf16.mxu0 %v1967_v29  ;;  %v3343_v28 = vld [vmem:[%s3136_s15 + $0xd0] sm:$0xff] }
 0x162   : > { %805 = vmatmul.mubr.f32.gmra.mrb[4].mxu1 %v3271_v34  ;;  %765 = vmatmul.mubr.f32.gmra.mrb[4].mxu0 %v3274_v35  ;;  %v3346_v29 = vld [vmem:[%s3136_s15 + $0x50] sm:$0xff] }
 0x163   : > { %1938 = vmatpush3.bf16.msra.mxu1 %v1937_v36  ;;  %1970 = vmatpush3.bf16.msra.mxu0 %v1969_v37  ;;  %v1063_v36 = vld [vmem:[%s3159_s1 + $0x60] sm:$0xff]  ;;  %v1064_v37 = vld [vmem:[%s3159_s1 + $0x68] sm:$0xff] }
 0x164   : > { %809 = vmatprep.mubr.f32.mxu1 %v3283_v42  ;;  %769 = vmatprep.mubr.f32.mxu0 %v3286_v43 }
 0x165   : > { %1940 = vmatprep.subr.bf16.mxu1 %v1939_v44  ;;  %1972 = vmatprep.subr.bf16.mxu0 %v1971_v45  ;;  %v881_v44 = vld [vmem:[%s3156_s7 + $0xf0] sm:$0xff]  ;;  %v882_v45 = vld [vmem:[%s3156_s7 + $0xf8] sm:$0xff]  ;;  %s3872_s7 = sld [smem:[#allocation43_spill]] }
 0x166   : > { %810 = vmatmul.mubr.f32.gmra.mrb[6].mxu1 %v3295_v50  ;;  %770 = vmatmul.mubr.f32.gmra.mrb[6].mxu0 %v3298_v51  ;;  %v1955_v62 = vpack.c.bf16 %v882_v45, %v881_v44 }
 0x167   : > { %1942 = vmatpush3.bf16.msra.mxu1 %v1941_v52  ;;  %1974 = vmatpush3.bf16.msra.mxu0 %v1973_v53  ;;  %v1953_v52 = vpack.c.bf16 %v864_v33, %v863_v32  ;;  %v1985_v53 = vpack.c.bf16 %v1064_v37, %v1063_v36 }
 0x168   : > { %814 = vmatprep.mubr.f32.mxu1 %v3307_v58  ;;  %774 = vmatprep.mubr.f32.mxu0 %v3310_v59 }
 0x169   : > { %1944 = vmatprep.subr.bf16.mxu1 %v1943_v60  ;;  %1976 = vmatprep.subr.bf16.mxu0 %v1975_v61  ;;  %v3377_v60 = vld [vmem:[%s3136_s15 + $0xf8] sm:$0xff] }
 0x16a   : > { %815 = vmatmul.mubr.f32.gmra.mrb[8].mxu1 %v3319_v4  ;;  %775 = vmatmul.mubr.f32.gmra.mrb[8].mxu0 %v3322_v5  ;;  %v634_v61 = vld [vmem:[%s3136_s15 + $0x78] sm:$0xff]  ;;  %s1274_s15 = sadd.s32 %s3870_s2, %s1652_s22  ;;  %s3512_s2 = scalar_lea.sflag [#allocation4], %s598_s14 }
 0x16b   : > { %1946 = vmatpush3.bf16.msra.mxu1 %v1945_v6  ;;  %1978 = vmatpush3.bf16.msra.mxu0 %v1977_v7  ;;  %v1957_v6 = vpack.c.bf16 %v866_v55, %v865_v54  ;;  %v1989_v7 = vpack.c.bf16 %v1066_v57, %v1065_v56  ;;  %s1276_s6 = sadd.s32 %s1639_s19, %s1274_s15  ;;  %p3874_p10 = scmp.ne.s32.totalorder %s3872_s7, 0 }
 0x16c   : > { %819 = vmatprep.mubr.f32.mxu1 %v3331_v14  ;;  %779 = vmatprep.mubr.f32.mxu0 %v3334_v15  ;;  %s3486_s16 = sshll.u32 %s1276_s6, 7 }
 0x16d   : > { %1948 = vmatprep.subr.bf16.mxu1 %v1947_v18  ;;  %1980 = vmatprep.subr.bf16.mxu0 %v1979_v19  ;;  %p2408_p1 = pnand %p2407_p5, %p3874_p10 }
 0x16e   : > { %820 = vmatmul.mubr.f32.gmra.mrb[10].mxu1 %v3343_v28  ;;  %780 = vmatmul.mubr.f32.gmra.mrb[10].mxu0 %v3346_v29 }
 0x16f   : > { %1950 = vmatpush3.bf16.msra.mxu1 %v1949_v30  ;;  %1982 = vmatpush3.bf16.msra.mxu0 %v1981_v31  ;;  %p2409_p3 = pneg %p2408_p1 }
 0x170   : > { %824 = vmatprep.mubr.f32.mxu1 %v3355_v38  ;;  %784 = vmatprep.mubr.f32.mxu0 %v3358_v39 }
 0x171   : > { %1952 = vmatprep.subr.bf16.mxu1 %v1951_v40  ;;  %1984 = vmatprep.subr.bf16.mxu0 %v1983_v41 }
 0x172   : > { %825 = vmatmul.mubr.f32.gmra.mrb[12].mxu1 %v3367_v48  ;;  %785 = vmatmul.mubr.f32.gmra.mrb[12].mxu0 %v631_v49 }
 0x173   : > { %1954 = vmatpush3.bf16.msra.mxu1 %v1953_v52  ;;  %1986 = vmatpush3.bf16.msra.mxu0 %v1985_v53 }
 0x174   : > { %829 = vmatprep.mubr.f32.mxu1 %v3377_v60  ;;  %789 = vmatprep.mubr.f32.mxu0 %v634_v61 }
 0x175   : > { %1956 = vmatprep.subr.bf16.mxu1 %v1955_v62  ;;  %1988 = vmatprep.subr.bf16.mxu0 %v1987_v63 }
 0x176   : > { %830 = vmatmul.mubr.f32.gmra.mrb[14].mxu1 %v3382_v2  ;;  %790 = vmatmul.mubr.f32.gmra.mrb[14].mxu0 %v633_v3 }
 0x177   : > { %1958 = vmatpush3.bf16.msra.mxu1 %v1957_v6  ;;  %1990 = vmatpush3.bf16.msra.mxu0 %v1989_v7 }
 0x178   : > { %954 = vmatprep.mubr.f32.mxu1 %v3195_v26  ;;  %1154 = vmatprep.mubr.f32.mxu0 %v3195_v26 }
 0x17a   : > { %955 = vmatmul.mubr.f32.vlgmr.msra.gmra.mrb[16].mxu1 %v3228_v1  ;;  %1155 = vmatmul.mubr.f32.vlgmr.msra.gmra.mrb[16].mxu0 %v3228_v1 }
 0x17b   : > { %959 = vmatprep.mubr.f32.mxu1 %v3238_v9  ;;  %1159 = vmatprep.mubr.f32.mxu0 %v3238_v9 }
 0x17e   : > { %960 = vmatmul.mubr.f32.gmra.mrb[18].mxu1 %v3250_v17  ;;  %1160 = vmatmul.mubr.f32.gmra.mrb[18].mxu0 %v3250_v17 }
 0x17f   : > { %964 = vmatprep.mubr.f32.mxu1 %v3262_v27  ;;  %1164 = vmatprep.mubr.f32.mxu0 %v3262_v27 }
 0x182   : > { %965 = vmatmul.mubr.f32.gmra.mrb[20].mxu1 %v3274_v35  ;;  %1165 = vmatmul.mubr.f32.gmra.mrb[20].mxu0 %v3274_v35 }
 0x183   : > { %969 = vmatprep.mubr.f32.mxu1 %v3286_v43  ;;  %1169 = vmatprep.mubr.f32.mxu0 %v3286_v43 }
 0x186   : > { %970 = vmatmul.mubr.f32.gmra.mrb[22].mxu1 %v3298_v51  ;;  %1170 = vmatmul.mubr.f32.gmra.mrb[22].mxu0 %v3298_v51 }
 0x187   : > { %974 = vmatprep.mubr.f32.mxu1 %v3310_v59  ;;  %1174 = vmatprep.mubr.f32.mxu0 %v3310_v59 }
 0x18a   : > { %975 = vmatmul.mubr.f32.gmra.mrb[24].mxu1 %v3322_v5  ;;  %1175 = vmatmul.mubr.f32.gmra.mrb[24].mxu0 %v3322_v5 }
 0x18b   : > { %979 = vmatprep.mubr.f32.mxu1 %v3334_v15  ;;  %1179 = vmatprep.mubr.f32.mxu0 %v3334_v15 }
 0x18e   : > { %980 = vmatmul.mubr.f32.gmra.mrb[26].mxu1 %v3346_v29  ;;  %1180 = vmatmul.mubr.f32.gmra.mrb[26].mxu0 %v3346_v29 }
 0x18f   : > { %984 = vmatprep.mubr.f32.mxu1 %v3358_v39  ;;  %1184 = vmatprep.mubr.f32.mxu0 %v3358_v39 }
 0x192   : > { %985 = vmatmul.mubr.f32.gmra.mrb[28].mxu1 %v631_v49  ;;  %1185 = vmatmul.mubr.f32.gmra.mrb[28].mxu0 %v631_v49 }
 0x193   : > { %989 = vmatprep.mubr.f32.mxu1 %v634_v61  ;;  %1189 = vmatprep.mubr.f32.mxu0 %v634_v61 }
 0x196   : > { %990 = vmatmul.mubr.f32.gmra.mrb[30].mxu1 %v633_v3  ;;  %1190 = vmatmul.mubr.f32.gmra.mrb[30].mxu0 %v633_v3 }
 0x197   : > { %994 = vmatprep.mubr.f32.mxu1 %v3191_v25  ;;  %1194 = vmatprep.mubr.f32.mxu0 %v3191_v25 }
 0x19a   : > { %995 = vmatmul.mubr.f32.gmra.mrb[32].mxu1 %v3225_v0  ;;  %1195 = vmatmul.mubr.f32.gmra.mrb[32].mxu0 %v3225_v0  ;;  %v3452_v0 = vld [vmem:[%s527_s8] ss:$0 sm:$0xff]  ;;  %s3873_s8 = sld [smem:[#allocation51_spill]] }
 0x19b   : > { %999 = vmatprep.mubr.f32.mxu1 %v3235_v8  ;;  %1199 = vmatprep.mubr.f32.mxu0 %v3235_v8 }
 0x19e   : > { %1000 = vmatmul.mubr.f32.gmra.mrb[34].mxu1 %v3247_v16  ;;  %1200 = vmatmul.mubr.f32.gmra.mrb[34].mxu0 %v3247_v16 }
 0x19f   : > { %1004 = vmatprep.mubr.f32.mxu1 %v3259_v24  ;;  %1204 = vmatprep.mubr.f32.mxu0 %v3259_v24 }
 0x1a0   : > { %s3497_s4 = scalar_lea.hbm %s3873_s8, %s3486_s16 }
 0x1a2   : > { %1005 = vmatmul.mubr.f32.gmra.mrb[36].mxu1 %v3271_v34  ;;  %1205 = vmatmul.mubr.f32.gmra.mrb[36].mxu0 %v3271_v34 }
 0x1a3   : > { %1009 = vmatprep.mubr.f32.mxu1 %v3283_v42  ;;  %1209 = vmatprep.mubr.f32.mxu0 %v3283_v42 }
 0x1a6   : > { %1010 = vmatmul.mubr.f32.gmra.mrb[38].mxu1 %v3295_v50  ;;  %1210 = vmatmul.mubr.f32.gmra.mrb[38].mxu0 %v3295_v50 }
 0x1a7   : > { %1014 = vmatprep.mubr.f32.mxu1 %v3307_v58  ;;  %1214 = vmatprep.mubr.f32.mxu0 %v3307_v58 }
 0x1aa   : > { %1015 = vmatmul.mubr.f32.gmra.mrb[40].mxu1 %v3319_v4  ;;  %1215 = vmatmul.mubr.f32.gmra.mrb[40].mxu0 %v3319_v4 }
 0x1ab   : > { %1019 = vmatprep.mubr.f32.mxu1 %v3331_v14  ;;  %1219 = vmatprep.mubr.f32.mxu0 %v3331_v14 }
 0x1ae   : > { %1020 = vmatmul.mubr.f32.gmra.mrb[42].mxu1 %v3343_v28  ;;  %1220 = vmatmul.mubr.f32.gmra.mrb[42].mxu0 %v3343_v28 }
 0x1af   : > { %1024 = vmatprep.mubr.f32.mxu1 %v3355_v38  ;;  %1224 = vmatprep.mubr.f32.mxu0 %v3355_v38 }
 0x1b2   : > { %1025 = vmatmul.mubr.f32.gmra.mrb[44].mxu1 %v3367_v48  ;;  %1225 = vmatmul.mubr.f32.gmra.mrb[44].mxu0 %v3367_v48 }
 0x1b3   : > { %1029 = vmatprep.mubr.f32.mxu1 %v3377_v60  ;;  %1229 = vmatprep.mubr.f32.mxu0 %v3377_v60 }
 0x1b6   : > { %1030 = vmatmul.mubr.f32.gmra.mrb[46].mxu1 %v3382_v2  ;;  %1230 = vmatmul.mubr.f32.gmra.mrb[46].mxu0 %v3382_v2 }
 0x22d   : > { %v1711_v25 = vpop.f32.mrb[0].mxu1  ;;  %v1687_v26 = vpop.f32.mrb[0].mxu0 }
 0x22e   : > { %v1712_v1 = vpop.f32.mrb[1].mxu1  ;;  %v1688_v8 = vpop.f32.mrb[1].mxu0 }
 0x22f   : > { %v1713_v9 = vadd.f32 %v1712_v1, %v1711_v25  ;;  %v1689_v16 = vadd.f32 %v1688_v8, %v1687_v26  ;;  %v3503_v8 = vld [vmem:[%s535_s20] ss:$0 sm:$0xff]  ;;  %s2653_s20 = smov [#allocation14]  }
 0x230   : > { %s2410_s22 = sshll.u32 %s2653_s20, 4  ;;  %s2411_s22 = int_to_ptr.vmem [resolvable:$false] %s2410_s22 }
 0x231   : > { %v797_v17 = vadd.f32 %v1713_v9, %v3452_v0  ;;  %v757_v24 = vadd.f32 %v1689_v16, %v3452_v0  ;;  %v1714_v27 = vpop.f32.mrb[2].mxu1  ;;  %v1690_v34 = vpop.f32.mrb[2].mxu0  ;;  %v3506_v16 = vld [vmem:[%s543_s12] ss:$0 sm:$0xff]  ;;  %s2412_s17 = scalar_lea.vmem %s2411_s22, 4096  ;;  %p2413_p4 = scmp.lt.s32.totalorder %s3499_s30, %s2411_s22 }
 0x232   : > { %v1715_v35 = vpop.f32.mrb[3].mxu1  ;;  %v1691_v42 = vpop.f32.mrb[3].mxu0  ;;  %p2414_p9 = scmp.lt.s32.totalorder %s2412_s17, %s2406_s18 }
 0x233   : > { %843 = vst [vmem:[%s3457_s9 + $0x40] sm:$0xff] %v797_v17  ;;  %835 = vst [vmem:[%s3457_s9] sm:$0xff] %v757_v24  ;;  %v1716_v43 = vadd.f32 %v1715_v35, %v1714_v27  ;;  %v1692_v50 = vadd.f32 %v1691_v42, %v1690_v34 }
 0x234   : > { %p2415_p6 = por %p2414_p9, %p2413_p4 }
 0x235   : > { %v802_v51 = vadd.f32 %v1716_v43, %v3452_v0  ;;  %v762_v58 = vadd.f32 %v1692_v50, %v3452_v0  ;;  %v1717_v59 = vpop.f32.mrb[4].mxu1  ;;  %v1693_v4 = vpop.f32.mrb[4].mxu0 }
 0x236   : > { %v1718_v5 = vpop.f32.mrb[5].mxu1  ;;  %v1694_v10 = vpop.f32.mrb[5].mxu0  ;;  %p2416_p8 = pnand %p2415_p6, %p2409_p3 }
 0x237   : > { %844 = vst [vmem:[%s3457_s9 + $0x48] sm:$0xff] %v802_v51  ;;  %836 = vst [vmem:[%s3457_s9 + $0x8] sm:$0xff] %v762_v58  ;;  %v1719_v11 = vadd.f32 %v1718_v5, %v1717_v59  ;;  %v1695_v12 = vadd.f32 %v1694_v10, %v1693_v4 }
 0x239   : > { %v807_v13 = vadd.f32 %v1719_v11, %v3452_v0  ;;  %v767_v14 = vadd.f32 %v1695_v12, %v3452_v0  ;;  %v1720_v15 = vpop.f32.mrb[6].mxu1  ;;  %v1696_v18 = vpop.f32.mrb[6].mxu0 }
 0x23a   : > { %v1721_v19 = vpop.f32.mrb[7].mxu1  ;;  %v1697_v20 = vpop.f32.mrb[7].mxu0 }
 0x23b   : > { %845 = vst [vmem:[%s3457_s9 + $0x50] sm:$0xff] %v807_v13  ;;  %837 = vst [vmem:[%s3457_s9 + $0x10] sm:$0xff] %v767_v14  ;;  %v1722_v21 = vadd.f32 %v1721_v19, %v1720_v15  ;;  %v1698_v22 = vadd.f32 %v1697_v20, %v1696_v18 }
 0x23d   : > { %v812_v23 = vadd.f32 %v1722_v21, %v3452_v0  ;;  %v772_v28 = vadd.f32 %v1698_v22, %v3452_v0  ;;  %v1723_v29 = vpop.f32.mrb[8].mxu1  ;;  %v1699_v30 = vpop.f32.mrb[8].mxu0 }
 0x23e   : > { %v1724_v31 = vpop.f32.mrb[9].mxu1  ;;  %v1700_v32 = vpop.f32.mrb[9].mxu0 }
 0x23f   : > { %846 = vst [vmem:[%s3457_s9 + $0x58] sm:$0xff] %v812_v23  ;;  %838 = vst [vmem:[%s3457_s9 + $0x18] sm:$0xff] %v772_v28  ;;  %v1725_v33 = vadd.f32 %v1724_v31, %v1723_v29  ;;  %v1701_v36 = vadd.f32 %v1700_v32, %v1699_v30 }
 0x241   : > { %v817_v37 = vadd.f32 %v1725_v33, %v3452_v0  ;;  %v777_v38 = vadd.f32 %v1701_v36, %v3452_v0  ;;  %v1726_v39 = vpop.f32.mrb[10].mxu1  ;;  %v1702_v40 = vpop.f32.mrb[10].mxu0 }
 0x242   : > { %v1727_v41 = vpop.f32.mrb[11].mxu1  ;;  %v1703_v44 = vpop.f32.mrb[11].mxu0 }
 0x243   : > { %847 = vst [vmem:[%s3457_s9 + $0x60] sm:$0xff] %v817_v37  ;;  %839 = vst [vmem:[%s3457_s9 + $0x20] sm:$0xff] %v777_v38  ;;  %v1728_v45 = vadd.f32 %v1727_v41, %v1726_v39  ;;  %v1704_v46 = vadd.f32 %v1703_v44, %v1702_v40 }
 0x245   : > { %v822_v47 = vadd.f32 %v1728_v45, %v3452_v0  ;;  %v782_v48 = vadd.f32 %v1704_v46, %v3452_v0  ;;  %v1729_v49 = vpop.f32.mrb[12].mxu1  ;;  %v1705_v52 = vpop.f32.mrb[12].mxu0 }
 0x246   : > { %v1730_v53 = vpop.f32.mrb[13].mxu1  ;;  %v1706_v54 = vpop.f32.mrb[13].mxu0 }
 0x247   : > { %848 = vst [vmem:[%s3457_s9 + $0x68] sm:$0xff] %v822_v47  ;;  %840 = vst [vmem:[%s3457_s9 + $0x28] sm:$0xff] %v782_v48  ;;  %v1731_v55 = vadd.f32 %v1730_v53, %v1729_v49  ;;  %v1707_v56 = vadd.f32 %v1706_v54, %v1705_v52 }
 0x249   : > { %v827_v57 = vadd.f32 %v1731_v55, %v3452_v0  ;;  %v787_v60 = vadd.f32 %v1707_v56, %v3452_v0  ;;  %v1732_v61 = vpop.f32.mrb[14].mxu1  ;;  %v1708_v62 = vpop.f32.mrb[14].mxu0 }
 0x24a   : > { %v1733_v63 = vpop.f32.mrb[15].mxu1  ;;  %v1709_v2 = vpop.f32.mrb[15].mxu0 }
 0x24b   : > { %849 = vst [vmem:[%s3457_s9 + $0x70] sm:$0xff] %v827_v57  ;;  %841 = vst [vmem:[%s3457_s9 + $0x30] sm:$0xff] %v787_v60  ;;  %v1734_v3 = vadd.f32 %v1733_v63, %v1732_v61  ;;  %v1710_v6 = vadd.f32 %v1709_v2, %v1708_v62 }
 0x24d   : > { %v832_v7 = vadd.f32 %v1734_v3, %v3452_v0  ;;  %v792_v25 = vadd.f32 %v1710_v6, %v3452_v0  ;;  %v1767_v26 = vpop.f32.mrb[16].mxu1  ;;  %v1847_v1 = vpop.f32.mrb[16].mxu0 }
 0x24e   : > { %v1768_v9 = vpop.f32.mrb[17].mxu1  ;;  %v1848_v0 = vpop.f32.mrb[17].mxu0 }
 0x24f   : > { %850 = vst [vmem:[%s3457_s9 + $0x78] sm:$0xff] %v832_v7  ;;  %842 = vst [vmem:[%s3457_s9 + $0x38] sm:$0xff] %v792_v25  ;;  %v1769_v17 = vadd.f32 %v1768_v9, %v1767_v26  ;;  %v1849_v24 = vadd.f32 %v1848_v0, %v1847_v1 }
 0x250   : > { %2419 = shalt.err (!%p2416_p8)
}
 0x251   : > { %s2420_s28 = scalar_lea.hbm %s3497_s4, 2048  ;;  %s2424_s15 = scalar_lea.hbm %s3873_s8, 16384 }
 0x252   : > { %p2421_p0 = scmp.ne.s32.totalorder %s3497_s4, %s2420_s28  ;;  %p2425_p11 = scmp.lt.u32.totalorder %s3497_s4, %s3873_s8 }
 0x253   : > { %p2426_p7 = scmp.lt.u32.totalorder %s2424_s15, %s2420_s28  ;;  %p2428_p5 = scmp.lt.u32.totalorder %s2420_s28, %s3497_s4 }
 0x254   : > { %p2422_p2 = pnand %p2421_p0, %p3874_p10 }
 0x255   : > { %p2427_p13 = por %p2426_p7, %p2425_p11 }
 0x256   : > { %p2423_p12 = pneg %p2422_p2 }
 0x257   : > { %p2429_p1 = por %p2428_p5, %p2427_p13 }
 0x259   : > { %p2430_p3 = pnand %p2429_p1, %p2423_p12 }
 0x25b   : > { %2433 = shalt.err (!%p2430_p3)
}
 0x25c   : > { %s3788_s26 = smov 128   ;;  %s3790_s1 = smov 256   ;;  %v957_v27 = vadd.f32 %v1769_v17, %v3503_v8  ;;  %v1157_v34 = vadd.f32 %v1849_v24, %v3506_v16  ;;  %v1770_v35 = vpop.f32.mrb[18].mxu1  ;;  %v1850_v42 = vpop.f32.mrb[18].mxu0 }
 0x25d   : > { %s2656_s12 = smov 8   ;;  %v1771_v43 = vpop.f32.mrb[19].mxu1  ;;  %v1851_v50 = vpop.f32.mrb[19].mxu0  ;;  %s3542_s18 = scalar_lea.vmem [#allocation15], %s3448_s0 }
 0x25e   : > { %2021 = dma.vmem_to_hbm [thread:$0]  (%p3874_p10), %s3499_s30, 2048, %s3497_s4, %s3512_s2, %s3788_s26, %s3790_s1, %s2656_s12   ;;  %v1772_v51 = vadd.f32 %v1771_v43, %v1770_v35  ;;  %v1852_v58 = vadd.f32 %v1851_v50, %v1850_v42  ;;  %v1773_v5 = vpop.f32.mrb[20].mxu1  ;;  %v1853_v10 = vpop.f32.mrb[20].mxu0 }
 0x25f   : > { %1035 = vst [vmem:[%s3542_s18] sm:$0xff] %v957_v27  ;;  %s3546_s20 = scalar_lea.vmem [#allocation17], %s3448_s0  ;;  %v1774_v11 = vpop.f32.mrb[21].mxu1  ;;  %v1854_v12 = vpop.f32.mrb[21].mxu0  ;;  %s1299_s0 = sshll.u32 %s3542_s18, 4  ;;  %s3615_s0 = int_to_ptr.vmem [resolvable:$true] %s1299_s0 }
 0x260   : > { %1235 = vst [vmem:[%s3546_s20] sm:$0xff] %v1157_v34  ;;  %v962_v59 = vadd.f32 %v1772_v51, %v3503_v8  ;;  %v1162_v4 = vadd.f32 %v1852_v58, %v3506_v16  ;;  %v1775_v13 = vadd.f32 %v1774_v11, %v1773_v5  ;;  %v1855_v14 = vadd.f32 %v1854_v12, %v1853_v10  ;;  %v1776_v19 = vpop.f32.mrb[22].mxu1  ;;  %v1856_v20 = vpop.f32.mrb[22].mxu0  ;;  %s1319_s30 = sshll.u32 %s3546_s20, 4  ;;  %s3875_s22 = sld [smem:[#allocation52_spill]]  ;;  %s3623_s30 = int_to_ptr.vmem [resolvable:$true] %s1319_s30 }
 0x261   : > { %v1777_v21 = vpop.f32.mrb[23].mxu1  ;;  %v1857_v22 = vpop.f32.mrb[23].mxu0  ;;  %s3877_s15 = sld [smem:[#allocation53_spill]]  ;;  %s1257_s26 = scalar_lea.sflag [#allocation16], %s3143_s25 }
 0x262   : > { %1036 = vst [vmem:[%s3542_s18 + $0x8] sm:$0xff] %v962_v59  ;;  %1236 = vst [vmem:[%s3546_s20 + $0x8] sm:$0xff] %v1162_v4  ;;  %v967_v15 = vadd.f32 %v1775_v13, %v3503_v8  ;;  %v1167_v18 = vadd.f32 %v1855_v14, %v3506_v16  ;;  %v1778_v23 = vadd.f32 %v1777_v21, %v1776_v19  ;;  %v1779_v31 = vpop.f32.mrb[24].mxu1  ;;  %v1859_v32 = vpop.f32.mrb[24].mxu0  ;;  %s2434_s1 = scalar_lea.vmem %s3615_s0, 2048  ;;  %s2657_s4 = smov [#allocation15]  }
 0x263   : > { %v1858_v28 = vadd.f32 %v1857_v22, %v1856_v20  ;;  %v1780_v33 = vpop.f32.mrb[25].mxu1  ;;  %v1860_v36 = vpop.f32.mrb[25].mxu0  ;;  %p2435_p4 = scmp.ne.s32.totalorder %s3615_s0, %s2434_s1  ;;  %s2438_s2 = sshll.u32 %s2657_s4, 4  ;;  %s2439_s2 = int_to_ptr.vmem [resolvable:$false] %s2438_s2 }
 0x264   : > { %1037 = vst [vmem:[%s3542_s18 + $0x10] sm:$0xff] %v967_v15  ;;  %1237 = vst [vmem:[%s3546_s20 + $0x10] sm:$0xff] %v1167_v18  ;;  %v972_v29 = vadd.f32 %v1778_v23, %v3503_v8  ;;  %v1781_v37 = vadd.f32 %v1780_v33, %v1779_v31  ;;  %v1861_v38 = vadd.f32 %v1860_v36, %v1859_v32  ;;  %v1782_v41 = vpop.f32.mrb[26].mxu1  ;;  %v1862_v44 = vpop.f32.mrb[26].mxu0  ;;  %p2441_p8 = scmp.lt.s32.totalorder %s3615_s0, %s2439_s2 }
 0x265   : > { %v1172_v30 = vadd.f32 %v1858_v28, %v3506_v16  ;;  %v1783_v45 = vpop.f32.mrb[27].mxu1  ;;  %v1863_v46 = vpop.f32.mrb[27].mxu0  ;;  %p2436_p9 = pnand %p2435_p4, %p3874_p10 }
 0x266   : > { %1038 = vst [vmem:[%s3542_s18 + $0x18] sm:$0xff] %v972_v29  ;;  %v977_v39 = vadd.f32 %v1781_v37, %v3503_v8  ;;  %v1177_v40 = vadd.f32 %v1861_v38, %v3506_v16  ;;  %v1784_v47 = vadd.f32 %v1783_v45, %v1782_v41  ;;  %v1864_v48 = vadd.f32 %v1863_v46, %v1862_v44  ;;  %v1785_v53 = vpop.f32.mrb[28].mxu1  ;;  %v1865_v54 = vpop.f32.mrb[28].mxu0  ;;  %s3876_s28 = smov %s3875_s22  ;;  %s3613_s17 = scalar_lea.hbm %s3875_s22, %s3486_s16 }
 0x267   : > { %1238 = vst [vmem:[%s3546_s20 + $0x18] sm:$0xff] %v1172_v30  ;;  %v1786_v55 = vpop.f32.mrb[29].mxu1  ;;  %v1866_v56 = vpop.f32.mrb[29].mxu0  ;;  %s3878_s6 = smov %s3877_s15  ;;  %s3621_s19 = scalar_lea.hbm %s3877_s15, %s3486_s16 }
 0x268   : > { %1039 = vst [vmem:[%s3542_s18 + $0x20] sm:$0xff] %v977_v39  ;;  %1239 = vst [vmem:[%s3546_s20 + $0x20] sm:$0xff] %v1177_v40  ;;  %v982_v49 = vadd.f32 %v1784_v47, %v3503_v8  ;;  %v1182_v52 = vadd.f32 %v1864_v48, %v3506_v16  ;;  %v1787_v57 = vadd.f32 %v1786_v55, %v1785_v53  ;;  %p2437_p6 = pneg %p2436_p9  ;;  %s2440_s22 = scalar_lea.vmem %s2439_s2, 4096 }
 0x269   : > { %v1867_v60 = vadd.f32 %v1866_v56, %v1865_v54  ;;  %v1788_v63 = vpop.f32.mrb[30].mxu1  ;;  %v1868_v2 = vpop.f32.mrb[30].mxu0  ;;  %p2442_p0 = scmp.lt.s32.totalorder %s2440_s22, %s2434_s1 }
 0x26a   : > { %1040 = vst [vmem:[%s3542_s18 + $0x28] sm:$0xff] %v982_v49  ;;  %1240 = vst [vmem:[%s3546_s20 + $0x28] sm:$0xff] %v1182_v52  ;;  %v987_v61 = vadd.f32 %v1787_v57, %v3503_v8  ;;  %v1789_v3 = vpop.f32.mrb[31].mxu1  ;;  %v1869_v6 = vpop.f32.mrb[31].mxu0 }
 0x26b   : > { %v1187_v62 = vadd.f32 %v1867_v60, %v3506_v16  ;;  %v1790_v7 = vadd.f32 %v1789_v3, %v1788_v63  ;;  %v1870_v25 = vadd.f32 %v1869_v6, %v1868_v2  ;;  %p2443_p2 = por %p2442_p0, %p2441_p8 }
 0x26c   : > { %1041 = vst [vmem:[%s3542_s18 + $0x30] sm:$0xff] %v987_v61 }
 0x26d   : > { %1241 = vst [vmem:[%s3546_s20 + $0x30] sm:$0xff] %v1187_v62  ;;  %v992_v26 = vadd.f32 %v1790_v7, %v3503_v8  ;;  %v1192_v1 = vadd.f32 %v1870_v25, %v3506_v16  ;;  %v1791_v9 = vpop.f32.mrb[32].mxu1  ;;  %v1871_v0 = vpop.f32.mrb[32].mxu0  ;;  %p2444_p12 = pnand %p2443_p2, %p2437_p6 }
 0x26e   : > { %v1792_v17 = vpop.f32.mrb[33].mxu1  ;;  %v1872_v24 = vpop.f32.mrb[33].mxu0 }
 0x26f   : > { %1042 = vst [vmem:[%s3542_s18 + $0x38] sm:$0xff] %v992_v26  ;;  %1242 = vst [vmem:[%s3546_s20 + $0x38] sm:$0xff] %v1192_v1  ;;  %v1793_v27 = vadd.f32 %v1792_v17, %v1791_v9  ;;  %v1873_v34 = vadd.f32 %v1872_v24, %v1871_v0 }
 0x271   : > { %v997_v35 = vadd.f32 %v1793_v27, %v3503_v8  ;;  %v1197_v42 = vadd.f32 %v1873_v34, %v3506_v16  ;;  %v1794_v43 = vpop.f32.mrb[34].mxu1  ;;  %v1874_v50 = vpop.f32.mrb[34].mxu0 }
 0x272   : > { %v1795_v51 = vpop.f32.mrb[35].mxu1  ;;  %v1875_v58 = vpop.f32.mrb[35].mxu0 }
 0x273   : > { %1043 = vst [vmem:[%s3542_s18 + $0x40] sm:$0xff] %v997_v35  ;;  %1243 = vst [vmem:[%s3546_s20 + $0x40] sm:$0xff] %v1197_v42  ;;  %v1796_v59 = vadd.f32 %v1795_v51, %v1794_v43  ;;  %v1876_v4 = vadd.f32 %v1875_v58, %v1874_v50 }
 0x275   : > { %v1002_v5 = vadd.f32 %v1796_v59, %v3503_v8  ;;  %v1202_v10 = vadd.f32 %v1876_v4, %v3506_v16  ;;  %v1797_v11 = vpop.f32.mrb[36].mxu1  ;;  %v1877_v12 = vpop.f32.mrb[36].mxu0 }
 0x276   : > { %v1798_v13 = vpop.f32.mrb[37].mxu1  ;;  %v1878_v14 = vpop.f32.mrb[37].mxu0 }
 0x277   : > { %1044 = vst [vmem:[%s3542_s18 + $0x48] sm:$0xff] %v1002_v5  ;;  %1244 = vst [vmem:[%s3546_s20 + $0x48] sm:$0xff] %v1202_v10  ;;  %v1799_v15 = vadd.f32 %v1798_v13, %v1797_v11  ;;  %v1879_v18 = vadd.f32 %v1878_v14, %v1877_v12 }
 0x279   : > { %v1007_v19 = vadd.f32 %v1799_v15, %v3503_v8  ;;  %v1207_v20 = vadd.f32 %v1879_v18, %v3506_v16  ;;  %v1800_v21 = vpop.f32.mrb[38].mxu1  ;;  %v1880_v22 = vpop.f32.mrb[38].mxu0 }
 0x27a   : > { %v1801_v23 = vpop.f32.mrb[39].mxu1  ;;  %v1881_v28 = vpop.f32.mrb[39].mxu0 }
 0x27b   : > { %1045 = vst [vmem:[%s3542_s18 + $0x50] sm:$0xff] %v1007_v19  ;;  %1245 = vst [vmem:[%s3546_s20 + $0x50] sm:$0xff] %v1207_v20  ;;  %v1802_v29 = vadd.f32 %v1801_v23, %v1800_v21  ;;  %v1882_v30 = vadd.f32 %v1881_v28, %v1880_v22 }
 0x27d   : > { %v1012_v31 = vadd.f32 %v1802_v29, %v3503_v8  ;;  %v1212_v32 = vadd.f32 %v1882_v30, %v3506_v16  ;;  %v1803_v33 = vpop.f32.mrb[40].mxu1  ;;  %v1883_v36 = vpop.f32.mrb[40].mxu0 }
 0x27e   : > { %v1804_v37 = vpop.f32.mrb[41].mxu1  ;;  %v1884_v38 = vpop.f32.mrb[41].mxu0 }
 0x27f   : > { %1046 = vst [vmem:[%s3542_s18 + $0x58] sm:$0xff] %v1012_v31  ;;  %1246 = vst [vmem:[%s3546_s20 + $0x58] sm:$0xff] %v1212_v32  ;;  %v1805_v39 = vadd.f32 %v1804_v37, %v1803_v33  ;;  %v1885_v40 = vadd.f32 %v1884_v38, %v1883_v36 }
 0x281   : > { %v1017_v41 = vadd.f32 %v1805_v39, %v3503_v8  ;;  %v1217_v44 = vadd.f32 %v1885_v40, %v3506_v16  ;;  %v1806_v45 = vpop.f32.mrb[42].mxu1  ;;  %v1886_v46 = vpop.f32.mrb[42].mxu0 }
 0x282   : > { %v1807_v47 = vpop.f32.mrb[43].mxu1  ;;  %v1887_v48 = vpop.f32.mrb[43].mxu0 }
 0x283   : > { %1047 = vst [vmem:[%s3542_s18 + $0x60] sm:$0xff] %v1017_v41  ;;  %1247 = vst [vmem:[%s3546_s20 + $0x60] sm:$0xff] %v1217_v44  ;;  %v1808_v49 = vadd.f32 %v1807_v47, %v1806_v45  ;;  %v1888_v52 = vadd.f32 %v1887_v48, %v1886_v46 }
 0x285   : > { %v1022_v53 = vadd.f32 %v1808_v49, %v3503_v8  ;;  %v1222_v54 = vadd.f32 %v1888_v52, %v3506_v16  ;;  %v1809_v55 = vpop.f32.mrb[44].mxu1  ;;  %v1889_v56 = vpop.f32.mrb[44].mxu0 }
 0x286   : > { %v1810_v57 = vpop.f32.mrb[45].mxu1  ;;  %v1890_v60 = vpop.f32.mrb[45].mxu0 }
 0x287   : > { %1048 = vst [vmem:[%s3542_s18 + $0x68] sm:$0xff] %v1022_v53  ;;  %1248 = vst [vmem:[%s3546_s20 + $0x68] sm:$0xff] %v1222_v54  ;;  %v1811_v61 = vadd.f32 %v1810_v57, %v1809_v55  ;;  %v1891_v62 = vadd.f32 %v1890_v60, %v1889_v56 }
 0x289   : > { %v1027_v63 = vadd.f32 %v1811_v61, %v3503_v8  ;;  %v1227_v2 = vadd.f32 %v1891_v62, %v3506_v16  ;;  %v1812_v3 = vpop.f32.mrb[46].mxu1  ;;  %v1892_v6 = vpop.f32.mrb[46].mxu0 }
 0x28a   : > { %v1813_v7 = vpop.f32.mrb[47].mxu1  ;;  %v1893_v25 = vpop.f32.mrb[47].mxu0 }
 0x28b   : > { %1049 = vst [vmem:[%s3542_s18 + $0x70] sm:$0xff] %v1027_v63  ;;  %1249 = vst [vmem:[%s3546_s20 + $0x70] sm:$0xff] %v1227_v2  ;;  %v1814_v26 = vadd.f32 %v1813_v7, %v1812_v3  ;;  %v1894_v1 = vadd.f32 %v1893_v25, %v1892_v6 }
 0x28d   : > { %v1032_v9 = vadd.f32 %v1814_v26, %v3503_v8  ;;  %v1232_v0 = vadd.f32 %v1894_v1, %v3506_v16 }
 0x28f   : > { %1050 = vst [vmem:[%s3542_s18 + $0x78] sm:$0xff] %v1032_v9  ;;  %1250 = vst [vmem:[%s3546_s20 + $0x78] sm:$0xff] %v1232_v0 }
 0x290   : > { %2447 = shalt.err (!%p2444_p12)
}
 0x291   : > { %s2448_s16 = scalar_lea.hbm %s3613_s17, 2048  ;;  %s2452_s14 = scalar_lea.hbm %s3876_s28, 16384 }
 0x292   : > { %p2449_p11 = scmp.ne.s32.totalorder %s3613_s17, %s2448_s16  ;;  %p2453_p5 = scmp.lt.u32.totalorder %s3613_s17, %s3876_s28 }
 0x293   : > { %p2454_p1 = scmp.lt.u32.totalorder %s2452_s14, %s2448_s16  ;;  %p2456_p4 = scmp.lt.u32.totalorder %s2448_s16, %s3613_s17 }
 0x294   : > { %p2450_p7 = pnand %p2449_p11, %p3874_p10 }
 0x295   : > { %p2455_p3 = por %p2454_p1, %p2453_p5 }
 0x296   : > { %p2451_p13 = pneg %p2450_p7 }
 0x297   : > { %p2457_p9 = por %p2456_p4, %p2455_p3 }
 0x299   : > { %p2458_p6 = pnand %p2457_p9, %p2451_p13 }
 0x29b   : > { %2461 = shalt.err (!%p2458_p6)
}
 0x29c   : > { %s3879_s1 = smov 256   ;;  %s3880_s4 = smov 128  }
 0x29d   : > { %2022 = dma.vmem_to_hbm [thread:$0]  (%p3874_p10), %s3615_s0, 2048, %s3613_s17, %s1257_s26, %s3880_s4, %s3879_s1, %s2656_s12  }
 0x29e   : > { %s2462_s2 = scalar_lea.vmem %s3623_s30, 2048  ;;  %s2658_s22 = smov [#allocation17]  }
 0x29f   : > { %p2463_p8 = scmp.ne.s32.totalorder %s3623_s30, %s2462_s2  ;;  %s2466_s16 = sshll.u32 %s2658_s22, 4  ;;  %s2467_s16 = int_to_ptr.vmem [resolvable:$false] %s2466_s16 }
 0x2a0   : > { %s2468_s18 = scalar_lea.vmem %s2467_s16, 4096  ;;  %p2469_p12 = scmp.lt.s32.totalorder %s3623_s30, %s2467_s16 }
 0x2a1   : > { %p2464_p0 = pnand %p2463_p8, %p3874_p10  ;;  %p2470_p11 = scmp.lt.s32.totalorder %s2468_s18, %s2462_s2 }
 0x2a3   : > { %p2465_p2 = pneg %p2464_p0  ;;  %p2471_p7 = por %p2470_p11, %p2469_p12 }
 0x2a5   : > { %p2472_p13 = pnand %p2471_p7, %p2465_p2 }
 0x2a7   : > { %2475 = shalt.err (!%p2472_p13)
}
 0x2a8   : > { %s2476_s0 = scalar_lea.hbm %s3621_s19, 2048  ;;  %s2480_s14 = scalar_lea.hbm %s3878_s6, 16384 }
 0x2a9   : > { %p2477_p5 = scmp.ne.s32.totalorder %s3621_s19, %s2476_s0  ;;  %p2481_p4 = scmp.lt.u32.totalorder %s3621_s19, %s3878_s6 }
 0x2aa   : > { %p2482_p9 = scmp.lt.u32.totalorder %s2480_s14, %s2476_s0  ;;  %p2484_p8 = scmp.lt.u32.totalorder %s2476_s0, %s3621_s19 }
 0x2ab   : > { %p2478_p1 = pnand %p2477_p5, %p3874_p10 }
 0x2ac   : > { %p2483_p6 = por %p2482_p9, %p2481_p4 }
 0x2ad   : > { %p2479_p3 = pneg %p2478_p1 }
 0x2ae   : > { %p2485_p0 = por %p2484_p8, %p2483_p6 }
 0x2b0   : > { %p2486_p2 = pnand %p2485_p0, %p2479_p3 }
 0x2b2   : > { %2489 = shalt.err (!%p2486_p2)
}
 0x2b3   : > { %2023 = dma.vmem_to_hbm [thread:$0]  (%p3874_p10), %s3623_s30, 2048, %s3621_s19, %s1257_s26, %s3880_s4, %s3879_s1, %s2656_s12  }
 0x2b4 PF: > { %s3881_s2 = sld [smem:[#allocation24_spill]]  ;;  %p2060_p12 = scmp.ge.s32.totalorder %s2640_s24, 2 }
 0x2b5   : > { %p3882_p11 = scmp.ne.s32.totalorder %s3843_s10, 0 }
 0x2b7   : > { %p2050_p7 = pnand %p2060_p12, %p3882_p11 }
 0x2ba   : > { %s1334_s22 = sand.u32 1, %s3881_s2  }
 0x2bb   : > { %s1335_s16 = scalar_lea.sflag [#allocation4], %s1334_s22 }
 0x2bc   : > { %2571 = dma.done.wait (!%p2050_p7), %s1335_s16, 2048  }
 0x2bd   : > { %2573 = vsyncadd (!%p2050_p7), %s1335_s16, 4294965248  ;;  %s3883_s7 = sadd.s32 4294967294, %s2640_s24  }
 0x2be   : > { %s1343_s18 = sand.u32 1, %s3883_s7  }
 0x2bf   : > { %s1344_s0 = scalar_lea.sflag [#allocation16], %s1343_s18 }
 0x2c0   : > { %2575 = dma.done.wait (!%p2050_p7), %s1344_s0, 4096  }
 0x2c1   : > { %2577 = vsyncadd (!%p2050_p7), %s1344_s0, 4294963200  ;;  %s38_s24 = sadd.s32 1, %s2640_s24   ;;  %s3885_s30 = sld [smem:[#allocation25_spill]] }
 0x2c2   : > { %p3687_p10 = scmp.ge.s32.totalorder %s38_s24, 10   ;;  %s3886_s12 = sld [smem:[#allocation26_spill]] }
 0x2c3   : > { %s3887_s26 = sld [smem:[#allocation27_spill]]  ;;  %s3888_s14 = sld [smem:[#allocation41_spill]] }
 0x2c4   : > { %s3889_s15 = sld [smem:[#allocation28_spill]]  ;;  %s3890_s16 = sld [smem:[#allocation29_spill]] }
 0x2c5   : > { %s3891_s17 = sld [smem:[#allocation42_spill]]  ;;  %s3892_s19 = sld [smem:[#allocation33_spill]] }
 0x2c6   : > { %s3893_s1 = sld [smem:[#allocation37_spill]]  ;;  %s3894_s22 = sld [smem:[#allocation38_spill]] }
 0x2c7   : > { %s3895_s4 = sld [smem:[#allocation40_spill]]  ;;  %s3896_s10 = smov %s2588_s11 }
 0x2c8   : > { %s3897_s11 = smov %s2983_s13  ;;  %s3899_s18 = smov %s2628_s21 }
 0x2c9   : > { %s3898_s13 = smov %s3887_s26  ;;  %s3900_s20 = smov %s2636_s23 }
 0x2ca   :  { %37 = sbr.rel (!%p3687_p10) target bundleno = 30 (0x1e), region = 197 }
 0x2cc   : > { %s3901_s21 = smov %s3893_s1 }
 0x2cd   : > { %s3902_s23 = smov %s3895_s4 }
 0x2d1   :  { %1358 = vsyncpa [#allocation3], 1 }
 0x2d2   :  { %1360 = vsyncpa [#allocation3 + $0x1], 1 }
 0x2d3   :  { %1361 = vsyncpa [#allocation6], 1 }
 0x2d4   :  { %1363 = vsyncpa [#allocation6 + $0x1], 1 }
 0x2d5   :  { %1364 = vsyncpa [#allocation9], 1 }
 0x2d6   :  { %1366 = vsyncpa [#allocation9 + $0x1], 1 }
 0x2d7   :  { %1367 = vsyncpa [#allocation12], 1 }
 0x2d8   :  { %1369 = vsyncpa [#allocation12 + $0x1], 1 }
 0x2d9   :  { %1370 = vsyncpa [#allocation4], 1 }
 0x2da   :  { %1372 = vsyncpa [#allocation4 + $0x1], 1 }
 0x2db   :  { %1373 = vsyncpa [#allocation16], 1 }
 0x2dc   :  { %1375 = vsyncpa [#allocation16 + $0x1], 1 }

</bundles_post_ra>
